<compile_context>
chip_gen: v5e
topology: v5e:2x2
jax: 0.10.0
libtpu: 0.0.40
codegen_flags: <defaults>
</compile_context>

<pallas_src>
import jax
import jax.numpy as jnp
from jax.experimental import pallas as pl
from jax.experimental.pallas import tpu as pltpu


# ------------------------------ fused kernel --------------------------------

def _make_resnet_kernel(block_meta, n_pool_rows):
    """block_meta: tuple of (stride, has_down, planes) per residual block."""
    n_blk = len(block_meta)
    n_sel = sum(1 for stride, _, _ in block_meta if stride == 2)

    def kernel(*refs):
        im_ref, w0_ref = refs[0], refs[1]
        blk_refs = [(refs[2 + 2 * i], refs[3 + 2 * i]) for i in range(n_blk)]
        base = 2 + 2 * n_blk
        sel_refs = refs[base:base + n_sel]
        fcw_ref = refs[base + n_sel]
        fcb_ref = refs[base + n_sel + 1]
        o_ref = refs[base + n_sel + 2]

        # ---- stem: 7x7 s2 conv as ONE large-K matmul + ReLU ----
        stem = jnp.dot(im_ref[...], w0_ref[...],
                       preferred_element_type=jnp.float32)
        stem = jnp.maximum(stem, 0.0)                  # (9 * n_pool_rows, 64)

        # ---- maxpool 3x3 s2 p1: running max over the 9 pool-tap groups ----
        # (zero rows stand in for the pool padding; valid since stem >= 0)
        x = stem[0:n_pool_rows]
        for g in range(1, 9):
            x = jnp.maximum(x, stem[g * n_pool_rows:(g + 1) * n_pool_rows])

        # ---- residual blocks (activation never leaves VMEM/registers) ----
        si = 0
        for (stride, has_down, planes), (w1_ref, w2_ref) in zip(block_meta,
                                                                blk_refs):
            if stride == 2:
                # stride-2 1x1-conv subsample == tiny per-sample row selection
                x = jnp.dot(sel_refs[si][...], x.astype(jnp.bfloat16),
                            preferred_element_type=jnp.float32)
                si += 1
            xb = x.astype(jnp.bfloat16)
            z = jnp.dot(xb, w1_ref[...], preferred_element_type=jnp.float32)
            if has_down:
                h = jnp.maximum(z[:, :planes], 0.0)    # main path
                iden = z[:, planes:]                   # fused downsample path
            else:
                h = jnp.maximum(z, 0.0)
                iden = x                               # identity (Cin == planes)
            y = jnp.dot(h.astype(jnp.bfloat16), w2_ref[...],
                        preferred_element_type=jnp.float32) + iden
            x = jnp.maximum(y, 0.0)

        # ---- adaptive avg-pool (mean over spatial rows) + FC ----
        pooled = jnp.mean(x, axis=0, keepdims=True)
        logits = jnp.dot(pooled.astype(jnp.bfloat16), fcw_ref[...],
                         preferred_element_type=jnp.float32) + fcb_ref[...]
        o_ref[...] = logits.astype(o_ref.dtype)

    return kernel


# ---------------------------- constant matrices ------------------------------

def _subsample_matrix(h, w, dtype):
    """One-hot (h/2*w/2, h*w) matrix selecting rows (2i, 2j) of a row-major
    (h*w, C) activation (== 1x1 conv with stride 2)."""
    i = jnp.arange(h // 2)[:, None]
    j = jnp.arange(w // 2)[None, :]
    src = ((2 * i) * w + 2 * j).reshape(-1)
    m = jnp.zeros(((h // 2) * (w // 2), h * w), jnp.float32)
    m = m.at[jnp.arange(src.shape[0]), src].set(1.0)
    return m.astype(dtype)


# -------------------------------- parameters ---------------------------------

def init_params(key, thin=4, layers=(1, 1, 1, 1), num_classes=10):
    keys = iter(jax.random.split(key, 64))

    def kaiming_conv(kh, kw, cin, cout):
        fan_out = cout * kh * kw                      # mode='fan_out', relu
        std = (2.0 / fan_out) ** 0.5
        return jax.random.normal(next(keys), (kh, kw, cin, cout),
                                 jnp.float32) * std

    params = {"conv1_w": kaiming_conv(7, 7, 3, 64)}   # (kh, kw, cin, cout)

    inplanes = 64
    base_planes = (64, 128, 256, 512)
    strides = (1, 2, 2, 2)
    layer_params = []
    for li in range(4):
        planes = base_planes[li] // thin
        blocks = []
        for bi in range(layers[li]):
            stride = strides[li] if bi == 0 else 1
            cin = inplanes
            blk = {
                "w1": kaiming_conv(1, 1, cin, planes).reshape(cin, planes),
                "w2": kaiming_conv(1, 1, planes, planes).reshape(planes, planes),
                "stride": stride,
                "w_down": None,
            }
            if stride != 1 or cin != planes:          # block.expansion == 1
                blk["w_down"] = kaiming_conv(1, 1, cin, planes).reshape(cin, planes)
            blocks.append(blk)
            inplanes = planes
        layer_params.append(blocks)
    params["layers"] = layer_params

    fc_in = base_planes[3] // thin
    bound = 1.0 / (fc_in ** 0.5)
    params["fc_w"] = jax.random.uniform(next(keys), (fc_in, num_classes),
                                        jnp.float32, -bound, bound)
    params["fc_b"] = jax.random.uniform(next(keys), (1, num_classes),
                                        jnp.float32, -bound, bound)
    return params


# ---------------------------------- forward ----------------------------------

def resnet_forward(params, x_nchw):
    f32, bf16 = jnp.float32, jnp.bfloat16
    x = jnp.transpose(x_nchw.astype(f32), (0, 2, 3, 1))          # NCHW -> NHWC
    n, h, w, cin = x.shape
    assert cin == 3 and h % 4 == 0 and w % 4 == 0

    ho, wo = h // 2, w // 2          # stem conv output (k=7, s=2, p=3)
    hq, wq = ho // 2, wo // 2        # maxpool output (k=3, s=2, p=1)
    k_dim = 49 * cin                 # 147

    # ---- pool-fused im2col for the stem (bf16, built once by XLA) ----
    xp = jnp.pad(x, ((0, 0), (3, 3), (3, 3), (0, 0))).astype(bf16)
    cols = []
    for di in range(7):
        for dj in range(7):
            cols.append(xp[:, di:di + 2 * ho:2, dj:dj + 2 * wo:2, :])
    patches = jnp.concatenate(cols, axis=-1)                  # (n, ho, wo, 147)
    # ring of zero patches == maxpool padding (conv of zero patch -> 0 -> relu 0)
    patches = jnp.pad(patches, ((0, 0), (1, 1), (1, 1), (0, 0)))
    groups = []
    for a in range(3):
        for b in range(3):
            groups.append(patches[:, a:a + 2 * hq:2, b:b + 2 * wq:2, :])
    im2col = jnp.stack(groups, axis=1)                        # (n, 9, hq, wq, 147)
    im2col = im2col.reshape(n, 9 * hq * wq, k_dim)            # (n, 576, 147) bf16

    w0 = params["conv1_w"].reshape(k_dim, 64).astype(bf16)    # (147, 64)

    # ---- pack trunk weights + per-sample subsample selectors ----
    inputs = [im2col, w0]
    block_meta, sels = [], []
    hc, wc = hq, wq
    for blocks in params["layers"]:
        for blk in blocks:
            stride, planes = blk["stride"], blk["w1"].shape[1]
            has_down = blk["w_down"] is not None
            w1d = (jnp.concatenate([blk["w1"], blk["w_down"]], axis=1)
                   if has_down else blk["w1"])                # fused [w1 | w_down]
            inputs.append(w1d.astype(bf16))
            inputs.append(blk["w2"].astype(bf16))
            if stride == 2:
                sels.append(_subsample_matrix(hc, wc, bf16))
                hc, wc = hc // 2, wc // 2
            block_meta.append((stride, has_down, planes))
    inputs.extend(sels)
    inputs.append(params["fc_w"].astype(bf16))
    inputs.append(params["fc_b"].astype(f32))

    num_classes = params["fc_w"].shape[1]
    kernel = _make_resnet_kernel(tuple(block_meta), hq * wq)

    in_specs = [pl.BlockSpec((None, 9 * hq * wq, k_dim), lambda b: (b, 0, 0))]
    in_specs += [pl.BlockSpec(a.shape, lambda b: (0, 0)) for a in inputs[1:]]

    # explicit VMEM budget: double-buffered inputs + generous headroom
    vmem_bytes = sum(int(a.size) * a.dtype.itemsize for a in inputs)
    vmem_limit = min(128 * 1024 * 1024, 2 * vmem_bytes + 16 * 1024 * 1024)

    out = pl.pallas_call(
        kernel,
        grid=(n,),
        in_specs=in_specs,
        out_specs=pl.BlockSpec((None, 1, num_classes), lambda b: (b, 0, 0)),
        out_shape=jax.ShapeDtypeStruct((n, 1, num_classes), f32),
        compiler_params=pltpu.CompilerParams(
            dimension_semantics=("parallel",),
            vmem_limit_bytes=vmem_limit),
    )(*inputs)
    return out.reshape(n, num_classes)


if __name__ == "__main__":
    key = jax.random.PRNGKey(0)
    pkey, xkey = jax.random.split(key)
    # Small config: thin=4 -> channel widths (16, 32, 64, 128), 1 block/stage,
    # 10 classes.  Input must have 3 channels (stem conv is 3 -> 64).
    params = init_params(pkey, thin=4, layers=(1, 1, 1, 1), num_classes=10)
    x = jax.random.normal(xkey, (2, 3, 32, 32), jnp.float32)     # NCHW like PyTorch

    fwd = jax.jit(lambda inp: resnet_forward(params, inp))
    out = jax.block_until_ready(fwd(x))
    assert out.shape == (2, 10) and out.dtype == jnp.float32
    print("KERNEL_OK")
</pallas_src>

<mosaic_0001>
module attributes {stable_mosaic.version = 11 : i64} {
  func.func @kernel(%arg0: i32, %arg1: memref<1x576x147xbf16, #tpu.memory_space<vmem>>, %arg2: memref<147x64xbf16, #tpu.memory_space<vmem>>, %arg3: memref<64x32xbf16, #tpu.memory_space<vmem>>, %arg4: memref<16x16xbf16, #tpu.memory_space<vmem>>, %arg5: memref<16x64xbf16, #tpu.memory_space<vmem>>, %arg6: memref<32x32xbf16, #tpu.memory_space<vmem>>, %arg7: memref<32x128xbf16, #tpu.memory_space<vmem>>, %arg8: memref<64x64xbf16, #tpu.memory_space<vmem>>, %arg9: memref<64x256xbf16, #tpu.memory_space<vmem>>, %arg10: memref<128x128xbf16, #tpu.memory_space<vmem>>, %arg11: memref<16x64xbf16, #tpu.memory_space<vmem>>, %arg12: memref<4x16xbf16, #tpu.memory_space<vmem>>, %arg13: memref<1x4xbf16, #tpu.memory_space<vmem>>, %arg14: memref<128x10xbf16, #tpu.memory_space<vmem>>, %arg15: memref<1x10xf32, #tpu.memory_space<vmem>>, %arg16: memref<1x1x10xf32, #tpu.memory_space<vmem>>) attributes {dimension_semantics = [#tpu.dimension_semantics<parallel>], iteration_bounds = array<i64: 2>, scalar_prefetch = 0 : i64, scratch_operands = 0 : i64, tpu.core_type = #tpu.core_type<tc>, window_params = [{transform_indices = @transform_0, window_bounds = array<i64: 1, 576, 147>}, {pipeline_mode = #tpu.pipeline_mode<synchronous>, transform_indices = @transform_1, window_bounds = array<i64: 147, 64>}, {pipeline_mode = #tpu.pipeline_mode<synchronous>, transform_indices = @transform_2, window_bounds = array<i64: 64, 32>}, {pipeline_mode = #tpu.pipeline_mode<synchronous>, transform_indices = @transform_3, window_bounds = array<i64: 16, 16>}, {pipeline_mode = #tpu.pipeline_mode<synchronous>, transform_indices = @transform_4, window_bounds = array<i64: 16, 64>}, {pipeline_mode = #tpu.pipeline_mode<synchronous>, transform_indices = @transform_5, window_bounds = array<i64: 32, 32>}, {pipeline_mode = #tpu.pipeline_mode<synchronous>, transform_indices = @transform_6, window_bounds = array<i64: 32, 128>}, {pipeline_mode = #tpu.pipeline_mode<synchronous>, transform_indices = @transform_7, window_bounds = array<i64: 64, 64>}, {pipeline_mode = #tpu.pipeline_mode<synchronous>, transform_indices = @transform_8, window_bounds = array<i64: 64, 256>}, {pipeline_mode = #tpu.pipeline_mode<synchronous>, transform_indices = @transform_9, window_bounds = array<i64: 128, 128>}, {pipeline_mode = #tpu.pipeline_mode<synchronous>, transform_indices = @transform_10, window_bounds = array<i64: 16, 64>}, {pipeline_mode = #tpu.pipeline_mode<synchronous>, transform_indices = @transform_11, window_bounds = array<i64: 4, 16>}, {pipeline_mode = #tpu.pipeline_mode<synchronous>, transform_indices = @transform_12, window_bounds = array<i64: 1, 4>}, {pipeline_mode = #tpu.pipeline_mode<synchronous>, transform_indices = @transform_13, window_bounds = array<i64: 128, 10>}, {pipeline_mode = #tpu.pipeline_mode<synchronous>, transform_indices = @transform_14, window_bounds = array<i64: 1, 10>}, {transform_indices = @transform_15, window_bounds = array<i64: 1, 1, 10>}]} {
    %c0 = arith.constant 0 : index
    %c0_0 = arith.constant 0 : index
    %c0_1 = arith.constant 0 : index
    %0 = vector.load %arg1[%c0, %c0_0, %c0_1] : memref<1x576x147xbf16, #tpu.memory_space<vmem>>, vector<1x576x147xbf16>
    %1 = vector.shape_cast %0 : vector<1x576x147xbf16> to vector<576x147xbf16>
    %c0_2 = arith.constant 0 : index
    %c0_3 = arith.constant 0 : index
    %2 = vector.load %arg2[%c0_2, %c0_3] : memref<147x64xbf16, #tpu.memory_space<vmem>>, vector<147x64xbf16>
    %cst = arith.constant dense<0.000000e+00> : vector<576x64xf32>
    %3 = tpu.matmul %1, %2, %cst {dimension_numbers = #tpu.dot_dimension_numbers<[1], [0], [0], [1], [0, 0, 1, 1], [], []>} : vector<576x147xbf16>, vector<147x64xbf16>, vector<576x64xf32> -> vector<576x64xf32>
    %cst_4 = arith.constant 0.000000e+00 : f32
    %4 = vector.broadcast %cst_4 : f32 to vector<576x64xf32>
    %5 = arith.maximumf %3, %4 : vector<576x64xf32>
    %6 = vector.extract_strided_slice %5 {offsets = [0, 0], sizes = [64, 64], strides = [1, 1]} : vector<576x64xf32> to vector<64x64xf32>
    %7 = vector.extract_strided_slice %5 {offsets = [64, 0], sizes = [64, 64], strides = [1, 1]} : vector<576x64xf32> to vector<64x64xf32>
    %8 = arith.maximumf %6, %7 : vector<64x64xf32>
    %9 = vector.extract_strided_slice %5 {offsets = [128, 0], sizes = [64, 64], strides = [1, 1]} : vector<576x64xf32> to vector<64x64xf32>
    %10 = arith.maximumf %8, %9 : vector<64x64xf32>
    %11 = vector.extract_strided_slice %5 {offsets = [192, 0], sizes = [64, 64], strides = [1, 1]} : vector<576x64xf32> to vector<64x64xf32>
    %12 = arith.maximumf %10, %11 : vector<64x64xf32>
    %13 = vector.extract_strided_slice %5 {offsets = [256, 0], sizes = [64, 64], strides = [1, 1]} : vector<576x64xf32> to vector<64x64xf32>
    %14 = arith.maximumf %12, %13 : vector<64x64xf32>
    %15 = vector.extract_strided_slice %5 {offsets = [320, 0], sizes = [64, 64], strides = [1, 1]} : vector<576x64xf32> to vector<64x64xf32>
    %16 = arith.maximumf %14, %15 : vector<64x64xf32>
    %17 = vector.extract_strided_slice %5 {offsets = [384, 0], sizes = [64, 64], strides = [1, 1]} : vector<576x64xf32> to vector<64x64xf32>
    %18 = arith.maximumf %16, %17 : vector<64x64xf32>
    %19 = vector.extract_strided_slice %5 {offsets = [448, 0], sizes = [64, 64], strides = [1, 1]} : vector<576x64xf32> to vector<64x64xf32>
    %20 = arith.maximumf %18, %19 : vector<64x64xf32>
    %21 = vector.extract_strided_slice %5 {offsets = [512, 0], sizes = [64, 64], strides = [1, 1]} : vector<576x64xf32> to vector<64x64xf32>
    %22 = arith.maximumf %20, %21 : vector<64x64xf32>
    %23 = arith.truncf %22 : vector<64x64xf32> to vector<64x64xbf16>
    %c0_5 = arith.constant 0 : index
    %c0_6 = arith.constant 0 : index
    %24 = vector.load %arg3[%c0_5, %c0_6] : memref<64x32xbf16, #tpu.memory_space<vmem>>, vector<64x32xbf16>
    %cst_7 = arith.constant dense<0.000000e+00> : vector<64x32xf32>
    %25 = tpu.matmul %23, %24, %cst_7 {dimension_numbers = #tpu.dot_dimension_numbers<[1], [0], [0], [1], [0, 0, 1, 1], [], []>} : vector<64x64xbf16>, vector<64x32xbf16>, vector<64x32xf32> -> vector<64x32xf32>
    %26 = vector.extract_strided_slice %25 {offsets = [0, 0], sizes = [64, 16], strides = [1, 1]} : vector<64x32xf32> to vector<64x16xf32>
    %cst_8 = arith.constant 0.000000e+00 : f32
    %27 = vector.broadcast %cst_8 : f32 to vector<64x16xf32>
    %28 = arith.maximumf %26, %27 : vector<64x16xf32>
    %29 = vector.extract_strided_slice %25 {offsets = [0, 16], sizes = [64, 16], strides = [1, 1]} : vector<64x32xf32> to vector<64x16xf32>
    %30 = arith.truncf %28 : vector<64x16xf32> to vector<64x16xbf16>
    %c0_9 = arith.constant 0 : index
    %c0_10 = arith.constant 0 : index
    %31 = vector.load %arg4[%c0_9, %c0_10] : memref<16x16xbf16, #tpu.memory_space<vmem>>, vector<16x16xbf16>
    %cst_11 = arith.constant dense<0.000000e+00> : vector<64x16xf32>
    %32 = tpu.matmul %30, %31, %cst_11 {dimension_numbers = #tpu.dot_dimension_numbers<[1], [0], [0], [1], [0, 0, 1, 1], [], []>} : vector<64x16xbf16>, vector<16x16xbf16>, vector<64x16xf32> -> vector<64x16xf32>
    %33 = arith.addf %32, %29 : vector<64x16xf32>
    %cst_12 = arith.constant 0.000000e+00 : f32
    %34 = vector.broadcast %cst_12 : f32 to vector<64x16xf32>
    %35 = arith.maximumf %33, %34 : vector<64x16xf32>
    %c0_13 = arith.constant 0 : index
    %c0_14 = arith.constant 0 : index
    %36 = vector.load %arg11[%c0_13, %c0_14] : memref<16x64xbf16, #tpu.memory_space<vmem>>, vector<16x64xbf16>
    %37 = arith.truncf %35 : vector<64x16xf32> to vector<64x16xbf16>
    %cst_15 = arith.constant dense<0.000000e+00> : vector<16x16xf32>
    %38 = tpu.matmul %36, %37, %cst_15 {dimension_numbers = #tpu.dot_dimension_numbers<[1], [0], [0], [1], [0, 0, 1, 1], [], []>} : vector<16x64xbf16>, vector<64x16xbf16>, vector<16x16xf32> -> vector<16x16xf32>
    %39 = arith.truncf %38 : vector<16x16xf32> to vector<16x16xbf16>
    %c0_16 = arith.constant 0 : index
    %c0_17 = arith.constant 0 : index
    %40 = vector.load %arg5[%c0_16, %c0_17] : memref<16x64xbf16, #tpu.memory_space<vmem>>, vector<16x64xbf16>
    %cst_18 = arith.constant dense<0.000000e+00> : vector<16x64xf32>
    %41 = tpu.matmul %39, %40, %cst_18 {dimension_numbers = #tpu.dot_dimension_numbers<[1], [0], [0], [1], [0, 0, 1, 1], [], []>} : vector<16x16xbf16>, vector<16x64xbf16>, vector<16x64xf32> -> vector<16x64xf32>
    %42 = vector.extract_strided_slice %41 {offsets = [0, 0], sizes = [16, 32], strides = [1, 1]} : vector<16x64xf32> to vector<16x32xf32>
    %cst_19 = arith.constant 0.000000e+00 : f32
    %43 = vector.broadcast %cst_19 : f32 to vector<16x32xf32>
    %44 = arith.maximumf %42, %43 : vector<16x32xf32>
    %45 = vector.extract_strided_slice %41 {offsets = [0, 32], sizes = [16, 32], strides = [1, 1]} : vector<16x64xf32> to vector<16x32xf32>
    %46 = arith.truncf %44 : vector<16x32xf32> to vector<16x32xbf16>
    %c0_20 = arith.constant 0 : index
    %c0_21 = arith.constant 0 : index
    %47 = vector.load %arg6[%c0_20, %c0_21] : memref<32x32xbf16, #tpu.memory_space<vmem>>, vector<32x32xbf16>
    %cst_22 = arith.constant dense<0.000000e+00> : vector<16x32xf32>
    %48 = tpu.matmul %46, %47, %cst_22 {dimension_numbers = #tpu.dot_dimension_numbers<[1], [0], [0], [1], [0, 0, 1, 1], [], []>} : vector<16x32xbf16>, vector<32x32xbf16>, vector<16x32xf32> -> vector<16x32xf32>
    %49 = arith.addf %48, %45 : vector<16x32xf32>
    %cst_23 = arith.constant 0.000000e+00 : f32
    %50 = vector.broadcast %cst_23 : f32 to vector<16x32xf32>
    %51 = arith.maximumf %49, %50 : vector<16x32xf32>
    %c0_24 = arith.constant 0 : index
    %c0_25 = arith.constant 0 : index
    %52 = vector.load %arg12[%c0_24, %c0_25] : memref<4x16xbf16, #tpu.memory_space<vmem>>, vector<4x16xbf16>
    %53 = arith.truncf %51 : vector<16x32xf32> to vector<16x32xbf16>
    %cst_26 = arith.constant dense<0.000000e+00> : vector<4x32xf32>
    %54 = tpu.matmul %52, %53, %cst_26 {dimension_numbers = #tpu.dot_dimension_numbers<[1], [0], [0], [1], [0, 0, 1, 1], [], []>} : vector<4x16xbf16>, vector<16x32xbf16>, vector<4x32xf32> -> vector<4x32xf32>
    %55 = arith.truncf %54 : vector<4x32xf32> to vector<4x32xbf16>
    %c0_27 = arith.constant 0 : index
    %c0_28 = arith.constant 0 : index
    %56 = vector.load %arg7[%c0_27, %c0_28] : memref<32x128xbf16, #tpu.memory_space<vmem>>, vector<32x128xbf16>
    %cst_29 = arith.constant dense<0.000000e+00> : vector<4x128xf32>
    %57 = tpu.matmul %55, %56, %cst_29 {dimension_numbers = #tpu.dot_dimension_numbers<[1], [0], [0], [1], [0, 0, 1, 1], [], []>} : vector<4x32xbf16>, vector<32x128xbf16>, vector<4x128xf32> -> vector<4x128xf32>
    %58 = vector.extract_strided_slice %57 {offsets = [0, 0], sizes = [4, 64], strides = [1, 1]} : vector<4x128xf32> to vector<4x64xf32>
    %cst_30 = arith.constant 0.000000e+00 : f32
    %59 = vector.broadcast %cst_30 : f32 to vector<4x64xf32>
    %60 = arith.maximumf %58, %59 : vector<4x64xf32>
    %61 = vector.extract_strided_slice %57 {offsets = [0, 64], sizes = [4, 64], strides = [1, 1]} : vector<4x128xf32> to vector<4x64xf32>
    %62 = arith.truncf %60 : vector<4x64xf32> to vector<4x64xbf16>
    %c0_31 = arith.constant 0 : index
    %c0_32 = arith.constant 0 : index
    %63 = vector.load %arg8[%c0_31, %c0_32] : memref<64x64xbf16, #tpu.memory_space<vmem>>, vector<64x64xbf16>
    %cst_33 = arith.constant dense<0.000000e+00> : vector<4x64xf32>
    %64 = tpu.matmul %62, %63, %cst_33 {dimension_numbers = #tpu.dot_dimension_numbers<[1], [0], [0], [1], [0, 0, 1, 1], [], []>} : vector<4x64xbf16>, vector<64x64xbf16>, vector<4x64xf32> -> vector<4x64xf32>
    %65 = arith.addf %64, %61 : vector<4x64xf32>
    %cst_34 = arith.constant 0.000000e+00 : f32
    %66 = vector.broadcast %cst_34 : f32 to vector<4x64xf32>
    %67 = arith.maximumf %65, %66 : vector<4x64xf32>
    %c0_35 = arith.constant 0 : index
    %c0_36 = arith.constant 0 : index
    %68 = vector.load %arg13[%c0_35, %c0_36] : memref<1x4xbf16, #tpu.memory_space<vmem>>, vector<1x4xbf16>
    %69 = arith.truncf %67 : vector<4x64xf32> to vector<4x64xbf16>
    %cst_37 = arith.constant dense<0.000000e+00> : vector<1x64xf32>
    %70 = tpu.matmul %68, %69, %cst_37 {dimension_numbers = #tpu.dot_dimension_numbers<[1], [0], [0], [1], [0, 0, 1, 1], [], []>} : vector<1x4xbf16>, vector<4x64xbf16>, vector<1x64xf32> -> vector<1x64xf32>
    %71 = arith.truncf %70 : vector<1x64xf32> to vector<1x64xbf16>
    %c0_38 = arith.constant 0 : index
    %c0_39 = arith.constant 0 : index
    %72 = vector.load %arg9[%c0_38, %c0_39] : memref<64x256xbf16, #tpu.memory_space<vmem>>, vector<64x256xbf16>
    %cst_40 = arith.constant dense<0.000000e+00> : vector<1x256xf32>
    %73 = tpu.matmul %71, %72, %cst_40 {dimension_numbers = #tpu.dot_dimension_numbers<[1], [0], [0], [1], [0, 0, 1, 1], [], []>} : vector<1x64xbf16>, vector<64x256xbf16>, vector<1x256xf32> -> vector<1x256xf32>
    %74 = vector.extract_strided_slice %73 {offsets = [0, 0], sizes = [1, 128], strides = [1, 1]} : vector<1x256xf32> to vector<1x128xf32>
    %cst_41 = arith.constant 0.000000e+00 : f32
    %75 = vector.broadcast %cst_41 : f32 to vector<1x128xf32>
    %76 = arith.maximumf %74, %75 : vector<1x128xf32>
    %77 = vector.extract_strided_slice %73 {offsets = [0, 128], sizes = [1, 128], strides = [1, 1]} : vector<1x256xf32> to vector<1x128xf32>
    %78 = arith.truncf %76 : vector<1x128xf32> to vector<1x128xbf16>
    %c0_42 = arith.constant 0 : index
    %c0_43 = arith.constant 0 : index
    %79 = vector.load %arg10[%c0_42, %c0_43] : memref<128x128xbf16, #tpu.memory_space<vmem>>, vector<128x128xbf16>
    %cst_44 = arith.constant dense<0.000000e+00> : vector<1x128xf32>
    %80 = tpu.matmul %78, %79, %cst_44 {dimension_numbers = #tpu.dot_dimension_numbers<[1], [0], [0], [1], [0, 0, 1, 1], [], []>} : vector<1x128xbf16>, vector<128x128xbf16>, vector<1x128xf32> -> vector<1x128xf32>
    %81 = arith.addf %80, %77 : vector<1x128xf32>
    %cst_45 = arith.constant 0.000000e+00 : f32
    %82 = vector.broadcast %cst_45 : f32 to vector<1x128xf32>
    %83 = arith.maximumf %81, %82 : vector<1x128xf32>
    %cst_46 = arith.constant dense<0.000000e+00> : vector<128xf32>
    %84 = vector.multi_reduction <add>, %83, %cst_46 [0] : vector<1x128xf32> to vector<128xf32>
    %85 = vector.shape_cast %84 : vector<128xf32> to vector<1x128xf32>
    %cst_47 = arith.constant 1.000000e+00 : f32
    %86 = vector.broadcast %cst_47 : f32 to vector<1x128xf32>
    %87 = arith.divf %85, %86 : vector<1x128xf32>
    %88 = arith.truncf %87 : vector<1x128xf32> to vector<1x128xbf16>
    %c0_48 = arith.constant 0 : index
    %c0_49 = arith.constant 0 : index
    %89 = vector.load %arg14[%c0_48, %c0_49] : memref<128x10xbf16, #tpu.memory_space<vmem>>, vector<128x10xbf16>
    %cst_50 = arith.constant dense<0.000000e+00> : vector<1x10xf32>
    %90 = tpu.matmul %88, %89, %cst_50 {dimension_numbers = #tpu.dot_dimension_numbers<[1], [0], [0], [1], [0, 0, 1, 1], [], []>} : vector<1x128xbf16>, vector<128x10xbf16>, vector<1x10xf32> -> vector<1x10xf32>
    %c0_51 = arith.constant 0 : index
    %c0_52 = arith.constant 0 : index
    %91 = vector.load %arg15[%c0_51, %c0_52] : memref<1x10xf32, #tpu.memory_space<vmem>>, vector<1x10xf32>
    %92 = arith.addf %90, %91 : vector<1x10xf32>
    %c0_53 = arith.constant 0 : index
    %c0_54 = arith.constant 0 : index
    %c0_55 = arith.constant 0 : index
    %93 = vector.load %arg16[%c0_53, %c0_54, %c0_55] : memref<1x1x10xf32, #tpu.memory_space<vmem>>, vector<1x1x10xf32>
    %94 = vector.shape_cast %93 : vector<1x1x10xf32> to vector<1x10xf32>
    %95 = vector.shape_cast %92 : vector<1x10xf32> to vector<1x1x10xf32>
    tpu.vector_store %arg16[%c0_53, %c0_54, %c0_55], %95 {strides = array<i32>} : memref<1x1x10xf32, #tpu.memory_space<vmem>>, vector<1x1x10xf32>,
    return
  }
  func.func @transform_0(%arg0: i32) -> (i32, i32, i32) {
    %c0_i32 = arith.constant 0 : i32
    %c0_i32_0 = arith.constant 0 : i32
    %c0_i32_1 = arith.constant 0 : i32
    return %arg0, %c0_i32, %c0_i32_0 : i32, i32, i32
  }
  func.func @transform_1(%arg0: i32) -> (i32, i32) {
    %c0_i32 = arith.constant 0 : i32
    %c0_i32_0 = arith.constant 0 : i32
    %c0_i32_1 = arith.constant 0 : i32
    return %c0_i32, %c0_i32_0 : i32, i32
  }
  func.func @transform_2(%arg0: i32) -> (i32, i32) {
    %c0_i32 = arith.constant 0 : i32
    %c0_i32_0 = arith.constant 0 : i32
    %c0_i32_1 = arith.constant 0 : i32
    return %c0_i32, %c0_i32_0 : i32, i32
  }
  func.func @transform_3(%arg0: i32) -> (i32, i32) {
    %c0_i32 = arith.constant 0 : i32
    %c0_i32_0 = arith.constant 0 : i32
    %c0_i32_1 = arith.constant 0 : i32
    return %c0_i32, %c0_i32_0 : i32, i32
  }
  func.func @transform_4(%arg0: i32) -> (i32, i32) {
    %c0_i32 = arith.constant 0 : i32
    %c0_i32_0 = arith.constant 0 : i32
    %c0_i32_1 = arith.constant 0 : i32
    return %c0_i32, %c0_i32_0 : i32, i32
  }
  func.func @transform_5(%arg0: i32) -> (i32, i32) {
    %c0_i32 = arith.constant 0 : i32
    %c0_i32_0 = arith.constant 0 : i32
    %c0_i32_1 = arith.constant 0 : i32
    return %c0_i32, %c0_i32_0 : i32, i32
  }
  func.func @transform_6(%arg0: i32) -> (i32, i32) {
    %c0_i32 = arith.constant 0 : i32
    %c0_i32_0 = arith.constant 0 : i32
    %c0_i32_1 = arith.constant 0 : i32
    return %c0_i32, %c0_i32_0 : i32, i32
  }
  func.func @transform_7(%arg0: i32) -> (i32, i32) {
    %c0_i32 = arith.constant 0 : i32
    %c0_i32_0 = arith.constant 0 : i32
    %c0_i32_1 = arith.constant 0 : i32
    return %c0_i32, %c0_i32_0 : i32, i32
  }
  func.func @transform_8(%arg0: i32) -> (i32, i32) {
    %c0_i32 = arith.constant 0 : i32
    %c0_i32_0 = arith.constant 0 : i32
    %c0_i32_1 = arith.constant 0 : i32
    return %c0_i32, %c0_i32_0 : i32, i32
  }
  func.func @transform_9(%arg0: i32) -> (i32, i32) {
    %c0_i32 = arith.constant 0 : i32
    %c0_i32_0 = arith.constant 0 : i32
    %c0_i32_1 = arith.constant 0 : i32
    return %c0_i32, %c0_i32_0 : i32, i32
  }
  func.func @transform_10(%arg0: i32) -> (i32, i32) {
    %c0_i32 = arith.constant 0 : i32
    %c0_i32_0 = arith.constant 0 : i32
    %c0_i32_1 = arith.constant 0 : i32
    return %c0_i32, %c0_i32_0 : i32, i32
  }
  func.func @transform_11(%arg0: i32) -> (i32, i32) {
    %c0_i32 = arith.constant 0 : i32
    %c0_i32_0 = arith.constant 0 : i32
    %c0_i32_1 = arith.constant 0 : i32
    return %c0_i32, %c0_i32_0 : i32, i32
  }
  func.func @transform_12(%arg0: i32) -> (i32, i32) {
    %c0_i32 = arith.constant 0 : i32
    %c0_i32_0 = arith.constant 0 : i32
    %c0_i32_1 = arith.constant 0 : i32
    return %c0_i32, %c0_i32_0 : i32, i32
  }
  func.func @transform_13(%arg0: i32) -> (i32, i32) {
    %c0_i32 = arith.constant 0 : i32
    %c0_i32_0 = arith.constant 0 : i32
    %c0_i32_1 = arith.constant 0 : i32
    return %c0_i32, %c0_i32_0 : i32, i32
  }
  func.func @transform_14(%arg0: i32) -> (i32, i32) {
    %c0_i32 = arith.constant 0 : i32
    %c0_i32_0 = arith.constant 0 : i32
    %c0_i32_1 = arith.constant 0 : i32
    return %c0_i32, %c0_i32_0 : i32, i32
  }
  func.func @transform_15(%arg0: i32) -> (i32, i32, i32) {
    %c0_i32 = arith.constant 0 : i32
    %c0_i32_0 = arith.constant 0 : i32
    %c0_i32_1 = arith.constant 0 : i32
    return %arg0, %c0_i32, %c0_i32_0 : i32, i32, i32
  }
}

</mosaic_0001>

<bundles_post_ra>
// kernel: _lambda_.1
= control target key start
LH: loop header
LB: loop body
LE: loop exit
PB: predicated region body
PF: predicated region fallthrough
CT: control target
= control target key end

     0   :  { %s3849_s0 = inlined_call_operand.vmem [shape: bf16[2,576,147], index: 0, kind: input, shape index: {}]   ;;  %s3850_s1 = inlined_call_operand.vmem [shape: bf16[147,64], index: 1, kind: input, shape index: {}]   ;;  %s3851_s2 = inlined_call_operand.vmem [shape: bf16[64,32], index: 2, kind: input, shape index: {}]   ;;  %s3852_s3 = inlined_call_operand.vmem [shape: bf16[16,16], index: 3, kind: input, shape index: {}]   ;;  %s3853_s4 = inlined_call_operand.vmem [shape: bf16[16,64], index: 4, kind: input, shape index: {}]   ;;  %s3854_s5 = inlined_call_operand.vmem [shape: bf16[32,32], index: 5, kind: input, shape index: {}]   ;;  %s3855_s6 = inlined_call_operand.vmem [shape: bf16[32,128], index: 6, kind: input, shape index: {}]   ;;  %s3856_s7 = inlined_call_operand.vmem [shape: bf16[64,64], index: 7, kind: input, shape index: {}]   ;;  %s3857_s8 = inlined_call_operand.vmem [shape: bf16[64,256], index: 8, kind: input, shape index: {}]   ;;  %s3858_s9 = inlined_call_operand.vmem [shape: bf16[128,128], index: 9, kind: input, shape index: {}]   ;;  %s3859_s10 = inlined_call_operand.vmem [shape: bf16[16,64], index: 10, kind: input, shape index: {}]   ;;  %s3860_s11 = inlined_call_operand.vmem [shape: bf16[4,16], index: 11, kind: input, shape index: {}]   ;;  %s3861_s12 = inlined_call_operand.vmem [shape: bf16[1,4], index: 12, kind: input, shape index: {}]   ;;  %s3862_s13 = inlined_call_operand.vmem [shape: bf16[128,10], index: 13, kind: input, shape index: {}]   ;;  %s3863_s14 = inlined_call_operand.vmem [shape: f32[1,10], index: 14, kind: input, shape index: {}]   ;;  %s3864_s15 = inlined_call_operand.hbm [shape: f32[2,1,10], index: 15, kind: output, shape index: {}]  }
   0x1   :  { %3868 = sst [smem:[#allocation14_spill]] %s3849_s0 }
   0x2   :  { %3869 = sst [smem:[#allocation15_spill]] %s3850_s1 }
   0x3   :  { %3870 = sst [smem:[#allocation16_spill]] %s3851_s2 }
   0x4   :  { %20 = vsyncpa [#allocation3], 0 }
   0x5   :  { %22 = vsyncpa [#allocation3 + $0x1], 0  ;;  %s3174_s18 = smov 0   ;;  %s3176_s19 = smov 0  }
   0x6   :  { %s3178_s20 = smov 0   ;;  %s3180_s21 = smov 0  }
   0x7 LB: > { %3871 = sst [smem:[#allocation5_spill]] %s3084_s20  ;;  %s3195_s22 = sadd.s32 4294967295, %s3088_s21   ;;  %s3088_s21 = sphi %s3180_s21, %s3891_s21   ;;  %s3084_s20 = sphi %s3178_s20, %s3893_s20   ;;  %s3080_s19 = sphi %s3176_s19, %s3895_s19   ;;  %s3076_s18 = sphi %s3174_s18, %s3894_s18  }
   0x8   : > { %s2312_s23 = sadd.s32 4294967294, %s3088_s21   ;;  %s3199_s24 = sadd.s32 1, %s3088_s21  }
   0x9   : > { %3872 = sst [smem:[#allocation6_spill]] %s3199_s24  ;;  %s355_s25 = sadd.s32 1, %s3084_s20 }
   0xa   : > { %s352_s26 = ssub.s32 %s3088_s21, %s3199_s24  ;;  %p365_p0 = scmp.ne.s32.totalorder %s3084_s20, %s3080_s19 }
   0xb   : > { %p353_p1 = scmp.eq.s32.totalorder %s352_s26, 0  ;;  %p366_p2 = scmp.eq.s32.totalorder %s3195_s22, 1 }
   0xc   : > { %p371_p3 = scmp.ne.s32.totalorder %s3080_s19, %s3076_s18  ;;  %p372_p4 = scmp.eq.s32.totalorder %s2312_s23, 1 }
   0xd   : > { %s3210_s27 = scalar_select %p353_p1, %s3084_s20, %s355_s25  }
   0xe   : > { %p3212_p5 = por %p366_p2, %p365_p0  ;;  %p3216_p6 = por %p372_p4, %p371_p3 }
   0xf   : > { %3873 = sst [smem:[#allocation7_spill]] %s3210_s27  ;;  %p2315_p7 = scmp.ge.s32.totalorder %s3088_s21, 1 }
  0x10   : > { %p440_p8 = scmp.lt.s32.totalorder %s3088_s21, 3 }
  0x12   : > { %p441_p9 = pnand %p2315_p7, %p440_p8 }
  0x14   : > { %444 = sbr.rel (%p441_p9) target bundleno = 2279 (0x8e7), region = 80 }
  0x19   : > { %s3876_s1 = sld [smem:[#allocation15_spill]]  ;;  %vm1074_vm0 = vcmask 1040384   ;;  %vm1075_vm1 = vcmask 1041408   ;;  %p487_p10 = scmp.lt.s32.totalorder %s3195_s22, 1  ;;  %v3090_v4 = vmov 65535   ;;  %vm965_vm2 = vcmask 154624  }
  0x1a   : > { %v1076_v5 = vsel %vm1074_vm0, 4294967295, %v3090_v4  ;;  %s3877_s0 = sld [smem:[#allocation14_spill]]  ;;  %vm1631_vm3 = vcmask 523264   ;;  %vm1725_vm4 = vcmask 130048   ;;  %s3091_s27 = smov 112   ;;  %vm1856_vm5 = vcmask 261120  }
  0x1b   : > { %v1077_v7 = vsel %vm1075_vm1, %v1076_v5, 0  ;;  %s488_s30 = scalar_select %p487_p10, %s3195_s22, 1  ;;  %vm1984_vm6 = vcmask 31744   ;;  %vm2242_vm7 = vcmask 73728  }
  0x1c   : > { %s3878_s2 = sld [smem:[#allocation16_spill]]  ;;  %s3046_s26 = scalar_lea.hbm %s3864_s15, 2 }
  0x1d   : > { %s2982_s16 = smul.u32 576, %s488_s30  ;;  %s3093_s30 = smov 64  }
  0x1f   : > { %v2931_v0 = vld [vmem:[%s3876_s1 + $0x38] sm:$0xff]  ;;  %v583_v1 = vld [vmem:[%s3876_s1 + $0x48] sm:$0x3]  ;;  %v2930_v3 = vld [vmem:[%s3876_s1 + $0x30] sm:$0xff] }
  0x20   : > { %v945_v2 = vunpack.c.l.b16 %v583_v1  ;;  %1081 = vmatpush.bf16.msra.mxu0 %v2931_v0  ;;  %2972 = vmatpush.bf16.msra.mxu2 %v2931_v0  ;;  %v2929_v9 = vld [vmem:[%s3876_s1 + $0x28] sm:$0xff]  ;;  %v2932_v10 = vld [vmem:[%s3876_s1 + $0x40] sm:$0xff]  ;;  %s3243_s24 = scalar_lea.vmem %s3877_s0, %s2982_s16  ;;  %v2927_v15 = vld [vmem:[%s3876_s1 + $0x18] sm:$0xff] }
  0x21   : > { %v2852_v11 = vld [vmem:[%s3243_s24 + $0x4] sm:$0xf]  ;;  %v2321_v12 = vld [vmem:[%s3243_s24 + $0x8] sm:$0xf0]  ;;  %v2926_v16 = vld [vmem:[%s3876_s1 + $0x10] sm:$0xff] }
  0x22   : > { %v955_v6 = vpack.c.b16 %v945_v2, %v945_v2  ;;  %v2324_v13 = vor.u32 %v2852_v11, %v2321_v12  ;;  %v2928_v14 = vld [vmem:[%s3876_s1 + $0x20] sm:$0xff]  ;;  %v2925_v17 = vld [vmem:[%s3876_s1 + $0x8] sm:$0xff]  ;;  %v2854_v18 = vld [vmem:[%s3243_s24 + $0x14] sm:$0xf] }
  0x23   : > { %v2329_v19 = vld [vmem:[%s3243_s24 + $0x18] sm:$0xf0]  ;;  %v2924_v21 = vld [vmem:[%s3876_s1] sm:$0xff]  ;;  %v2853_v23 = vld [vmem:[%s3243_s24 + $0x4] sm:$0xf0] }
  0x24   : > { %v1079_v8 = vand.u32 %v1077_v7, %v955_v6  ;;  %1082 = vmatpush.bf16.msra.mxu0 %v2930_v3  ;;  %2973 = vmatpush.bf16.msra.mxu2 %v2930_v3  ;;  %v2332_v20 = vor.u32 %v2854_v18, %v2329_v19  ;;  %v2319_v22 = vld [vmem:[%s3243_s24] sm:$0xf]  ;;  %v2856_v25 = vld [vmem:[%s3243_s24 + $0x24] sm:$0xf]  ;;  %v2337_v26 = vld [vmem:[%s3243_s24 + $0x28] sm:$0xf0] }
  0x25   : > { %v2320_v24 = vor.u32 %v2853_v23, %v2319_v22  ;;  %v2340_v27 = vor.u32 %v2856_v25, %v2337_v26  ;;  %v2327_v28 = vld [vmem:[%s3243_s24 + $0x10] sm:$0xf]  ;;  %v2855_v29 = vld [vmem:[%s3243_s24 + $0x14] sm:$0xf0]  ;;  %v2858_v31 = vld [vmem:[%s3243_s24 + $0x34] sm:$0xf] }
  0x26   : > { %1276 = vmatpush.bf16.msra.mxu1 %v1079_v8  ;;  %2980 = vmatpush.bf16.msra.mxu3 %v1079_v8  ;;  %v2328_v30 = vor.u32 %v2855_v29, %v2327_v28  ;;  %v2345_v32 = vld [vmem:[%s3243_s24 + $0x38] sm:$0xf0]  ;;  %v2335_v34 = vld [vmem:[%s3243_s24 + $0x20] sm:$0xf]  ;;  %v2857_v35 = vld [vmem:[%s3243_s24 + $0x24] sm:$0xf0] }
  0x27   : > { %v2348_v33 = vor.u32 %v2858_v31, %v2345_v32  ;;  %v2336_v36 = vor.u32 %v2857_v35, %v2335_v34  ;;  %v2860_v37 = vld [vmem:[%s3243_s24 + $0x44] sm:$0xf]  ;;  %v2353_v38 = vld [vmem:[%s3243_s24 + $0x48] sm:$0xf0]  ;;  %v2343_v40 = vld [vmem:[%s3243_s24 + $0x30] sm:$0xf] }
  0x28   : > { %1083 = vmatpush.bf16.msra.mxu0 %v2929_v9  ;;  %2974 = vmatpush.bf16.msra.mxu2 %v2929_v9  ;;  %v2356_v39 = vor.u32 %v2860_v37, %v2353_v38  ;;  %v2859_v41 = vld [vmem:[%s3243_s24 + $0x34] sm:$0xf0]  ;;  %v2862_v43 = vld [vmem:[%s3243_s24 + $0x54] sm:$0xf]  ;;  %v2361_v44 = vld [vmem:[%s3243_s24 + $0x58] sm:$0xf0] }
  0x29   : > { %v2344_v42 = vor.u32 %v2859_v41, %v2343_v40  ;;  %v2364_v45 = vor.u32 %v2862_v43, %v2361_v44  ;;  %v2351_v46 = vld [vmem:[%s3243_s24 + $0x40] sm:$0xf]  ;;  %v2861_v47 = vld [vmem:[%s3243_s24 + $0x44] sm:$0xf0]  ;;  %v2864_v49 = vld [vmem:[%s3243_s24 + $0x64] sm:$0xf] }
  0x2a   : > { %1277 = vmatpush.bf16.msra.mxu1 %v2932_v10  ;;  %2981 = vmatpush.bf16.msra.mxu3 %v2932_v10  ;;  %v2352_v48 = vor.u32 %v2861_v47, %v2351_v46  ;;  %v2369_v50 = vld [vmem:[%s3243_s24 + $0x68] sm:$0xf0]  ;;  %v2359_v52 = vld [vmem:[%s3243_s24 + $0x50] sm:$0xf]  ;;  %v2863_v53 = vld [vmem:[%s3243_s24 + $0x54] sm:$0xf0] }
  0x2b   : > { %v2372_v51 = vor.u32 %v2864_v49, %v2369_v50  ;;  %v2360_v54 = vor.u32 %v2863_v53, %v2359_v52  ;;  %v2866_v55 = vld [vmem:[%s3243_s24 + $0x74] sm:$0xf]  ;;  %v2377_v56 = vld [vmem:[%s3243_s24 + $0x78] sm:$0xf0]  ;;  %v2367_v58 = vld [vmem:[%s3243_s24 + $0x60] sm:$0xf] }
  0x2c   : > { %1084 = vmatpush.bf16.msra.mxu0 %v2928_v14  ;;  %2975 = vmatpush.bf16.msra.mxu2 %v2928_v14  ;;  %v2380_v57 = vor.u32 %v2866_v55, %v2377_v56  ;;  %v2865_v59 = vld [vmem:[%s3243_s24 + $0x64] sm:$0xf0]  ;;  %v2868_v61 = vld [vmem:[%s3243_s24 + $0x84] sm:$0xf]  ;;  %v2385_v62 = vld [vmem:[%s3243_s24 + $0x88] sm:$0xf0] }
  0x2d   : > { %2641 = vmatmul.msk.bf16.vlgmr.msra.gmra.mxu1 %vm965_vm2, %v2324_v13  ;;  %v2368_v60 = vor.u32 %v2865_v59, %v2367_v58  ;;  %v2388_v63 = vor.u32 %v2868_v61, %v2385_v62  ;;  %v2375_v0 = vld [vmem:[%s3243_s24 + $0x70] sm:$0xf]  ;;  %v2867_v1 = vld [vmem:[%s3243_s24 + $0x74] sm:$0xf0]  ;;  %v2870_v5 = vld [vmem:[%s3243_s24 + $0x94] sm:$0xf] }
  0x2e   : > { %v2376_v3 = vor.u32 %v2867_v1, %v2375_v0  ;;  %v2393_v6 = vld [vmem:[%s3243_s24 + $0x98] sm:$0xf0]  ;;  %v2383_v8 = vld [vmem:[%s3243_s24 + $0x80] sm:$0xf]  ;;  %v2869_v9 = vld [vmem:[%s3243_s24 + $0x84] sm:$0xf0] }
  0x2f   : > { %v2396_v7 = vor.u32 %v2870_v5, %v2393_v6  ;;  %v2503_v11 = vld [vmem:[%s3243_s24 + $0x170] sm:$0xf]  ;;  %v2899_v12 = vld [vmem:[%s3243_s24 + $0x174] sm:$0xf0]  ;;  %v2384_v14 = vor.u32 %v2869_v9, %v2383_v8  ;;  %v2511_v26 = vld [vmem:[%s3243_s24 + $0x180] sm:$0xf] }
  0x30   : > { %1085 = vmatpush.bf16.msra.mxu0 %v2927_v15  ;;  %2976 = vmatpush.bf16.msra.mxu2 %v2927_v15  ;;  %v2504_v13 = vor.u32 %v2899_v12, %v2503_v11  ;;  %v2391_v23 = vld [vmem:[%s3243_s24 + $0x90] sm:$0xf]  ;;  %v2900_v29 = vld [vmem:[%s3243_s24 + $0x184] sm:$0xf]  ;;  %v2874_v38 = vld [vmem:[%s3243_s24 + $0xb4] sm:$0xf] }
  0x31   : > { %v2399_v41 = vld [vmem:[%s3243_s24 + $0xa0] sm:$0xf]  ;;  %v2519_v44 = vld [vmem:[%s3243_s24 + $0x190] sm:$0xf]  ;;  %v2902_v47 = vld [vmem:[%s3243_s24 + $0x194] sm:$0xf] }
  0x32   : > { %v2876_v56 = vld [vmem:[%s3243_s24 + $0xc4] sm:$0xf]  ;;  %v2407_v59 = vld [vmem:[%s3243_s24 + $0xb0] sm:$0xf]  ;;  %v2527_v62 = vld [vmem:[%s3243_s24 + $0x1a0] sm:$0xf] }
  0x33   : > { %v2904_v1 = vld [vmem:[%s3243_s24 + $0x1a4] sm:$0xf]  ;;  %v2425_v11 = vld [vmem:[%s3243_s24 + $0xd8] sm:$0xf0] }
  0x34   : > { %1086 = vmatpush.bf16.msra.mxu0 %v2926_v16  ;;  %2977 = vmatpush.bf16.msra.mxu2 %v2926_v16 }
  0x38   : > { %1087 = vmatpush.bf16.msra.mxu0 %v2925_v17  ;;  %2978 = vmatpush.bf16.msra.mxu2 %v2925_v17 }
  0x3c   : > { %1088 = vmatpush.bf16.msra.mxu0 %v2924_v21  ;;  %2979 = vmatpush.bf16.msra.mxu2 %v2924_v21  ;;  %v2401_v21 = vld [vmem:[%s3243_s24 + $0xa8] sm:$0xf0] }
  0x3d   : > { %2642 = vmatmul.msk.bf16.gmra.mxu1 %vm965_vm2, %v2332_v20  ;;  %v2872_v20 = vld [vmem:[%s3243_s24 + $0xa4] sm:$0xf] }
  0x3e   : > { %v2404_v22 = vor.u32 %v2872_v20, %v2401_v21  ;;  %v2906_v21 = vld [vmem:[%s3243_s24 + $0x1b4] sm:$0xf] }
  0x3f   : > { %1089 = vmatmul.bf16.vlgmr.msra.gmra.mxu0 %v2320_v24  ;;  %1204 = vmatmul.bf16.vlgmr.msra.gmra.mxu2 %v2504_v13  ;;  %v2871_v24 = vld [vmem:[%s3243_s24 + $0x94] sm:$0xf0]  ;;  %v2415_v13 = vld [vmem:[%s3243_s24 + $0xc0] sm:$0xf] }
  0x40   : > { %v2392_v31 = vor.u32 %v2871_v24, %v2391_v23 }
  0x4d   : > { %2643 = vmatmul.msk.bf16.gmra.mxu1 %vm965_vm2, %v2340_v27  ;;  %v2901_v27 = vld [vmem:[%s3243_s24 + $0x184] sm:$0xf0] }
  0x4e   : > { %v2512_v28 = vor.u32 %v2901_v27, %v2511_v26 }
  0x4f   : > { %1094 = vmatmul.bf16.gmra.mxu0 %v2328_v30  ;;  %v2513_v30 = vld [vmem:[%s3243_s24 + $0x188] sm:$0xf0] }
  0x50   : > { %v2516_v32 = vor.u32 %v2900_v29, %v2513_v30  ;;  %1209 = vmatmul.bf16.gmra.mxu2 %v2512_v28 }
  0x52   : > { %2665 = vmatmul.msk.bf16.vlgmr.msra.gmra.mxu3 %vm965_vm2, %v2516_v32 }
  0x5d   : > { %2644 = vmatmul.msk.bf16.gmra.mxu1 %vm965_vm2, %v2348_v33 }
  0x5f   : > { %1099 = vmatmul.bf16.gmra.mxu0 %v2336_v36 }
  0x6d   : > { %2645 = vmatmul.msk.bf16.gmra.mxu1 %vm965_vm2, %v2356_v39  ;;  %v2409_v39 = vld [vmem:[%s3243_s24 + $0xb8] sm:$0xf0] }
  0x6e   : > { %v2412_v40 = vor.u32 %v2874_v38, %v2409_v39 }
  0x6f   : > { %1104 = vmatmul.bf16.gmra.mxu0 %v2344_v42  ;;  %v2873_v42 = vld [vmem:[%s3243_s24 + $0xa4] sm:$0xf0] }
  0x70   : > { %v2400_v49 = vor.u32 %v2873_v42, %v2399_v41  ;;  %v2879_v41 = vld [vmem:[%s3243_s24 + $0xd4] sm:$0xf0] }
  0x7d   : > { %2646 = vmatmul.msk.bf16.gmra.mxu1 %vm965_vm2, %v2364_v45  ;;  %v2903_v45 = vld [vmem:[%s3243_s24 + $0x194] sm:$0xf0] }
  0x7e   : > { %v2520_v46 = vor.u32 %v2903_v45, %v2519_v44  ;;  %v2909_v44 = vld [vmem:[%s3243_s24 + $0x1c4] sm:$0xf0] }
  0x7f   : > { %1109 = vmatmul.bf16.gmra.mxu0 %v2352_v48  ;;  %v2521_v48 = vld [vmem:[%s3243_s24 + $0x198] sm:$0xf0] }
  0x80   : > { %v2524_v50 = vor.u32 %v2902_v47, %v2521_v48  ;;  %1214 = vmatmul.bf16.gmra.mxu2 %v2520_v46  ;;  %v2908_v46 = vld [vmem:[%s3243_s24 + $0x1c4] sm:$0xf]  ;;  %v2545_v47 = vld [vmem:[%s3243_s24 + $0x1c8] sm:$0xf0] }
  0x82   : > { %2666 = vmatmul.msk.bf16.gmra.mxu3 %vm965_vm2, %v2524_v50 }
  0x8d   : > { %2647 = vmatmul.msk.bf16.gmra.mxu1 %vm965_vm2, %v2372_v51 }
  0x8f   : > { %1114 = vmatmul.bf16.gmra.mxu0 %v2360_v54 }
  0x9d   : > { %2648 = vmatmul.msk.bf16.gmra.mxu1 %vm965_vm2, %v2380_v57  ;;  %v2417_v57 = vld [vmem:[%s3243_s24 + $0xc8] sm:$0xf0] }
  0x9e   : > { %v2420_v58 = vor.u32 %v2876_v56, %v2417_v57 }
  0x9f   : > { %1119 = vmatmul.bf16.gmra.mxu0 %v2368_v60  ;;  %v2875_v60 = vld [vmem:[%s3243_s24 + $0xb4] sm:$0xf0] }
  0xaa   : > { %v1279_v2 = vpop.f32.mrf.mxu1 }
  0xad   : > { %2649 = vmatmul.msk.bf16.gmra.mxu1 %vm965_vm2, %v2388_v63  ;;  %v2905_v63 = vld [vmem:[%s3243_s24 + $0x1a4] sm:$0xf0] }
  0xae   : > { %v2528_v0 = vor.u32 %v2905_v63, %v2527_v62 }
  0xaf   : > { %1124 = vmatmul.bf16.gmra.mxu0 %v2376_v3  ;;  %v2408_v3 = vor.u32 %v2875_v60, %v2407_v59  ;;  %v2882_v59 = vld [vmem:[%s3243_s24 + $0xf4] sm:$0xf]  ;;  %v2441_v60 = vld [vmem:[%s3243_s24 + $0xf8] sm:$0xf0] }
  0xb0   : > { %1219 = vmatmul.bf16.gmra.mxu2 %v2528_v0  ;;  %v2444_v63 = vor.u32 %v2882_v59, %v2441_v60  ;;  %v2431_v0 = vld [vmem:[%s3243_s24 + $0xe0] sm:$0xf]  ;;  %v2914_v59 = vld [vmem:[%s3243_s24 + $0x1f4] sm:$0xf]  ;;  %v2569_v60 = vld [vmem:[%s3243_s24 + $0x1f8] sm:$0xf0] }
  0xb2   : > { %v1281_v4 = vpop.f32.mrf.mxu1 }
  0xba   : > { %v1284_v10 = vpop.f32.mrf.mxu1 }
  0xbc   : > { %v1090_v15 = vpop.f32.mrf.mxu0 }
  0xbd   : > { %2650 = vmatmul.msk.bf16.gmra.mxu1 %vm965_vm2, %v2396_v7  ;;  %v3310_v16 = vadd.f32 %v1279_v2, %v1090_v15  ;;  %v2529_v2 = vld [vmem:[%s3243_s24 + $0x1a8] sm:$0xf0] }
  0xbf   : > { %1129 = vmatmul.bf16.gmra.mxu0 %v2384_v14  ;;  %v2877_v14 = vld [vmem:[%s3243_s24 + $0xc4] sm:$0xf0]  ;;  %v1459_v27 = vmax.f32 %v3310_v16, 0.0 }
  0xc0   : > { %v2416_v23 = vor.u32 %v2877_v14, %v2415_v13 }
  0xc2   : > { %v1286_v17 = vpop.f32.mrf.mxu1 }
  0xc4   : > { %v1092_v18 = vpop.f32.mrf.mxu0 }
  0xc5   : > { %v3312_v19 = vadd.f32 %v1281_v4, %v1092_v18  ;;  %v2532_v4 = vor.u32 %v2904_v1, %v2529_v2  ;;  %v2907_v18 = vld [vmem:[%s3243_s24 + $0x1b4] sm:$0xf0]  ;;  %v2881_v1 = vld [vmem:[%s3243_s24 + $0xe4] sm:$0xf0] }
  0xc7   : > { %2667 = vmatmul.msk.bf16.gmra.mxu3 %vm965_vm2, %v2532_v4  ;;  %v2911_v4 = vld [vmem:[%s3243_s24 + $0x1d4] sm:$0xf0] }
  0xca   : > { %v1289_v25 = vpop.f32.mrf.mxu1 }
  0xcc   : > { %v1095_v33 = vpop.f32.mrf.mxu0 }
  0xcd   : > { %2651 = vmatmul.msk.bf16.gmra.mxu1 %vm965_vm2, %v2404_v22  ;;  %v3323_v34 = vadd.f32 %v1284_v10, %v1095_v33  ;;  %v2878_v10 = vld [vmem:[%s3243_s24 + $0xd4] sm:$0xf]  ;;  %v2537_v22 = vld [vmem:[%s3243_s24 + $0x1b8] sm:$0xf0]  ;;  %v2880_v33 = vld [vmem:[%s3243_s24 + $0xe4] sm:$0xf] }
  0xce   : > { %v2428_v12 = vor.u32 %v2878_v10, %v2425_v11  ;;  %v2540_v24 = vor.u32 %v2906_v21, %v2537_v22  ;;  %v2432_v10 = vor.u32 %v2881_v1, %v2431_v0  ;;  %v2884_v21 = vld [vmem:[%s3243_s24 + $0x104] sm:$0xf]  ;;  %v2449_v22 = vld [vmem:[%s3243_s24 + $0x108] sm:$0xf0]  ;;  %v3430_v1 = vpop.f32.mrf.mxu2 }
  0xcf   : > { %1134 = vmatmul.bf16.gmra.mxu0 %v2392_v31 }
  0xd2   : > { %v1291_v35 = vpop.f32.mrf.mxu1 }
  0xd4   : > { %v1097_v36 = vpop.f32.mrf.mxu0 }
  0xd5   : > { %v3326_v37 = vadd.f32 %v1286_v17, %v1097_v36  ;;  %v2535_v17 = vld [vmem:[%s3243_s24 + $0x1b0] sm:$0xf]  ;;  %v1460_v36 = vmax.f32 %v3312_v19, 0.0 }
  0xd6   : > { %v2536_v20 = vor.u32 %v2907_v18, %v2535_v17 }
  0xd7   : > { %2668 = vmatmul.msk.bf16.gmra.mxu3 %vm965_vm2, %v2540_v24 }
  0xd8   : > { %1224 = vmatmul.bf16.gmra.mxu2 %v2536_v20 }
  0xda   : > { %v1294_v43 = vpop.f32.mrf.mxu1 }
  0xdc   : > { %v1100_v51 = vpop.f32.mrf.mxu0 }
  0xdd   : > { %2652 = vmatmul.msk.bf16.gmra.mxu1 %vm965_vm2, %v2412_v40  ;;  %v3337_v52 = vadd.f32 %v1289_v25, %v1100_v51  ;;  %v2423_v40 = vld [vmem:[%s3243_s24 + $0xd0] sm:$0xf]  ;;  %v1461_v51 = vmax.f32 %v3323_v34, 0.0 }
  0xde   : > { %v2424_v48 = vor.u32 %v2879_v41, %v2423_v40 }
  0xdf   : > { %1139 = vmatmul.bf16.gmra.mxu0 %v2400_v49  ;;  %v2548_v49 = vor.u32 %v2908_v46, %v2545_v47  ;;  %v1463_v13 = vmax.f32 %v3337_v52, 0.0  ;;  %v2886_v46 = vld [vmem:[%s3243_s24 + $0x114] sm:$0xf]  ;;  %v2457_v47 = vld [vmem:[%s3243_s24 + $0x118] sm:$0xf0] }
  0xe2   : > { %v1296_v53 = vpop.f32.mrf.mxu1 }
  0xe4   : > { %v1102_v54 = vpop.f32.mrf.mxu0 }
  0xe5   : > { %v3340_v55 = vadd.f32 %v1291_v35, %v1102_v54  ;;  %v2433_v35 = vld [vmem:[%s3243_s24 + $0xe8] sm:$0xf0] }
  0xe6   : > { %v2436_v39 = vor.u32 %v2880_v33, %v2433_v35  ;;  %v2912_v33 = vld [vmem:[%s3243_s24 + $0x1e4] sm:$0xf]  ;;  %v2561_v35 = vld [vmem:[%s3243_s24 + $0x1e8] sm:$0xf0] }
  0xe7   : > { %2669 = vmatmul.msk.bf16.gmra.mxu3 %vm965_vm2, %v2548_v49 }
  0xea   : > { %v1299_v61 = vpop.f32.mrf.mxu1 }
  0xec   : > { %v1105_v5 = vpop.f32.mrf.mxu0 }
  0xed   : > { %2653 = vmatmul.msk.bf16.gmra.mxu1 %vm965_vm2, %v2420_v58  ;;  %v3351_v6 = vadd.f32 %v1294_v43, %v1105_v5  ;;  %v2543_v43 = vld [vmem:[%s3243_s24 + $0x1c0] sm:$0xf] }
  0xee   : > { %v2544_v45 = vor.u32 %v2909_v44, %v2543_v43 }
  0xef   : > { %1144 = vmatmul.bf16.gmra.mxu0 %v2408_v3  ;;  %v2551_v3 = vld [vmem:[%s3243_s24 + $0x1d0] sm:$0xf]  ;;  %v1465_v40 = vmax.f32 %v3351_v6, 0.0 }
  0xf0   : > { %1229 = vmatmul.bf16.gmra.mxu2 %v2544_v45  ;;  %v2552_v5 = vor.u32 %v2911_v4, %v2551_v3 }
  0xf2   : > { %v1301_v7 = vpop.f32.mrf.mxu1 }
  0xf4   : > { %v1107_v8 = vpop.f32.mrf.mxu0 }
  0xf5   : > { %v3354_v9 = vadd.f32 %v1296_v53, %v1107_v8  ;;  %v2553_v8 = vld [vmem:[%s3243_s24 + $0x1d8] sm:$0xf0] }
  0xfa   : > { %v1304_v15 = vpop.f32.mrf.mxu1 }
  0xfc   : > { %v1110_v25 = vpop.f32.mrf.mxu0 }
  0xfd   : > { %2654 = vmatmul.msk.bf16.gmra.mxu1 %vm965_vm2, %v2428_v12  ;;  %v1300_v26 = vadd.f32 %v1299_v61, %v1110_v25  ;;  %v1462_v61 = vmax.f32 %v3326_v37, 0.0  ;;  %v2452_v25 = vor.u32 %v2884_v21, %v2449_v22  ;;  %v2916_v21 = vld [vmem:[%s3243_s24 + $0x204] sm:$0xf]  ;;  %v2577_v22 = vld [vmem:[%s3243_s24 + $0x208] sm:$0xf0] }
  0xff   : > { %v1467_v28 = vmax.f32 %v1300_v26, 0.0  ;;  %1149 = vmatmul.bf16.gmra.mxu0 %v2416_v23  ;;  %v1464_v23 = vmax.f32 %v3340_v55, 0.0  ;;  %v2439_v26 = vld [vmem:[%s3243_s24 + $0xf0] sm:$0xf] }
 0x100   : > { %1234 = vmatmul.bf16.gmra.mxu2 %v2552_v5 }
 0x101   : > { %v3367_v29 = vmax.f32 %v1459_v27, %v1467_v28  ;;  %v2883_v27 = vld [vmem:[%s3243_s24 + $0xf4] sm:$0xf0] }
 0x102   : > { %v1306_v30 = vpop.f32.mrf.mxu1 }
 0x104   : > { %v1112_v31 = vpop.f32.mrf.mxu0 }
 0x105   : > { %v1302_v32 = vadd.f32 %v1301_v7, %v1112_v31  ;;  %v2910_v7 = vld [vmem:[%s3243_s24 + $0x1d4] sm:$0xf]  ;;  %v2913_v31 = vld [vmem:[%s3243_s24 + $0x1e4] sm:$0xf0] }
 0x106   : > { %v2556_v11 = vor.u32 %v2910_v7, %v2553_v8  ;;  %v2888_v7 = vld [vmem:[%s3243_s24 + $0x124] sm:$0xf]  ;;  %v2465_v8 = vld [vmem:[%s3243_s24 + $0x128] sm:$0xf0] }
 0x107   : > { %v1468_v38 = vmax.f32 %v1302_v32, 0.0 }
 0x108   : > { %2670 = vmatmul.msk.bf16.gmra.mxu3 %vm965_vm2, %v2556_v11  ;;  %v3437_v11 = vpop.f32.mrf.mxu2 }
 0x109   : > { %v3374_v16 = vmax.f32 %v1460_v36, %v1468_v38  ;;  %v2440_v36 = vor.u32 %v2883_v27, %v2439_v26  ;;  %v2564_v38 = vor.u32 %v2912_v33, %v2561_v35 }
 0x10a   : > { %v1309_v42 = vpop.f32.mrf.mxu1 }
 0x10c   : > { %v1115_v50 = vpop.f32.mrf.mxu0 }
 0x10d   : > { %2655 = vmatmul.msk.bf16.gmra.mxu1 %vm965_vm2, %v2436_v39  ;;  %v1305_v19 = vadd.f32 %v1304_v15, %v1115_v50  ;;  %v2460_v50 = vor.u32 %v2886_v46, %v2457_v47  ;;  %v2936_v46 = vld [vmem:[%s3878_s2 + $0x18] sm:$0xff]  ;;  %v2583_v47 = vld [vmem:[%s3243_s24 + $0x210] sm:$0xf] }
 0x10e   : > { %1648 = vmatpush.bf16.msrb.mxu2 %v2936_v46 }
 0x10f   : > { %v1469_v53 = vmax.f32 %v1305_v19, 0.0  ;;  %1154 = vmatmul.bf16.gmra.mxu0 %v2424_v48  ;;  %v1466_v48 = vmax.f32 %v3354_v9, 0.0  ;;  %v2447_v19 = vld [vmem:[%s3243_s24 + $0x100] sm:$0xf] }
 0x110   : > { %v1210_v27 = vpop.f32.mrf.mxu2 }
 0x111   : > { %v3383_v54 = vmax.f32 %v1461_v51, %v1469_v53  ;;  %v2885_v51 = vld [vmem:[%s3243_s24 + $0x104] sm:$0xf0] }
 0x112   : > { %v1311_v56 = vpop.f32.mrf.mxu1 }
 0x114   : > { %v1117_v57 = vpop.f32.mrf.mxu0 }
 0x115   : > { %v1307_v58 = vadd.f32 %v1306_v30, %v1117_v57  ;;  %v2559_v30 = vld [vmem:[%s3243_s24 + $0x1e0] sm:$0xf]  ;;  %v2915_v57 = vld [vmem:[%s3243_s24 + $0x1f4] sm:$0xf0] }
 0x116   : > { %v2560_v32 = vor.u32 %v2913_v31, %v2559_v30 }
 0x117   : > { %v1470_v62 = vmax.f32 %v1307_v58, 0.0 }
 0x118   : > { %1239 = vmatmul.bf16.gmra.mxu2 %v2560_v32  ;;  %2671 = vmatmul.msk.bf16.gmra.mxu3 %vm965_vm2, %v2564_v38  ;;  %v2473_v38 = vld [vmem:[%s3243_s24 + $0x138] sm:$0xf0] }
 0x119   : > { %v3390_v34 = vmax.f32 %v1462_v61, %v1470_v62  ;;  %v2448_v61 = vor.u32 %v2885_v51, %v2447_v19  ;;  %v2572_v62 = vor.u32 %v2914_v59, %v2569_v60  ;;  %v2585_v51 = vld [vmem:[%s3243_s24 + $0x218] sm:$0xf0] }
 0x11a   : > { %v1314_v2 = vpop.f32.mrf.mxu1 }
 0x11c   : > { %v1120_v12 = vpop.f32.mrf.mxu0 }
 0x11d   : > { %2656 = vmatmul.msk.bf16.gmra.mxu1 %vm965_vm2, %v2444_v63  ;;  %v1310_v37 = vadd.f32 %v1309_v42, %v1120_v12  ;;  %v2468_v12 = vor.u32 %v2888_v7, %v2465_v8  ;;  %v2471_v8 = vld [vmem:[%s3243_s24 + $0x130] sm:$0xf] }
 0x11f   : > { %v1471_v14 = vmax.f32 %v1310_v37, 0.0  ;;  %1159 = vmatmul.bf16.gmra.mxu0 %v2432_v10  ;;  %v2455_v37 = vld [vmem:[%s3243_s24 + $0x110] sm:$0xf] }
 0x121   : > { %v3399_v15 = vmax.f32 %v1463_v13, %v1471_v14  ;;  %v2887_v13 = vld [vmem:[%s3243_s24 + $0x114] sm:$0xf0] }
 0x122   : > { %v1316_v17 = vpop.f32.mrf.mxu1 }
 0x124   : > { %v1122_v18 = vpop.f32.mrf.mxu0 }
 0x125   : > { %v1312_v20 = vadd.f32 %v1311_v56, %v1122_v18  ;;  %v2567_v56 = vld [vmem:[%s3243_s24 + $0x1f0] sm:$0xf]  ;;  %v2575_v18 = vld [vmem:[%s3243_s24 + $0x200] sm:$0xf] }
 0x126   : > { %v2568_v58 = vor.u32 %v2915_v57, %v2567_v56 }
 0x127   : > { %v1472_v24 = vmax.f32 %v1312_v20, 0.0 }
 0x128   : > { %1244 = vmatmul.bf16.gmra.mxu2 %v2568_v58  ;;  %2672 = vmatmul.msk.bf16.gmra.mxu3 %vm965_vm2, %v2572_v62 }
 0x129   : > { %v3406_v52 = vmax.f32 %v1464_v23, %v1472_v24  ;;  %v2456_v23 = vor.u32 %v2887_v13, %v2455_v37  ;;  %v2580_v24 = vor.u32 %v2916_v21, %v2577_v22  ;;  %v2591_v13 = vld [vmem:[%s3243_s24 + $0x220] sm:$0xf] }
 0x12a   : > { %v1319_v28 = vpop.f32.mrf.mxu1 }
 0x12c   : > { %v1125_v39 = vpop.f32.mrf.mxu0 }
 0x12d   : > { %2657 = vmatmul.msk.bf16.gmra.mxu1 %vm965_vm2, %v2452_v25  ;;  %v1315_v55 = vadd.f32 %v1314_v2, %v1125_v39 }
 0x12f   : > { %v1473_v41 = vmax.f32 %v1315_v55, 0.0  ;;  %1164 = vmatmul.bf16.gmra.mxu0 %v2440_v36  ;;  %v2890_v36 = vld [vmem:[%s3243_s24 + $0x134] sm:$0xf]  ;;  %v3457_v55 = vpop.f32.mrf.mxu2 }
 0x131   : > { %v3415_v42 = vmax.f32 %v1465_v40, %v1473_v41  ;;  %v2476_v40 = vor.u32 %v2890_v36, %v2473_v38  ;;  %v2463_v41 = vld [vmem:[%s3243_s24 + $0x120] sm:$0xf]  ;;  %v2489_v36 = vld [vmem:[%s3243_s24 + $0x158] sm:$0xf0] }
 0x132   : > { %v1321_v43 = vpop.f32.mrf.mxu1 }
 0x134   : > { %v1127_v44 = vpop.f32.mrf.mxu0 }
 0x135   : > { %v1317_v45 = vadd.f32 %v1316_v17, %v1127_v44 }
 0x137   : > { %v1474_v49 = vmax.f32 %v1317_v45, 0.0  ;;  %v1215_v58 = vpop.f32.mrf.mxu2 }
 0x138   : > { %2673 = vmatmul.msk.bf16.gmra.mxu3 %vm965_vm2, %v2580_v24 }
 0x139   : > { %v3422_v6 = vmax.f32 %v1466_v48, %v1474_v49  ;;  %v2919_v48 = vld [vmem:[%s3243_s24 + $0x214] sm:$0xf0] }
 0x13a   : > { %v1324_v53 = vpop.f32.mrf.mxu1  ;;  %v2584_v49 = vor.u32 %v2919_v48, %v2583_v47  ;;  %v2599_v47 = vld [vmem:[%s3243_s24 + $0x230] sm:$0xf]  ;;  %v2923_v48 = vld [vmem:[%s3243_s24 + $0x234] sm:$0xf0] }
 0x13c   : > { %v1130_v63 = vpop.f32.mrf.mxu0 }
 0x13d   : > { %2658 = vmatmul.msk.bf16.gmra.mxu1 %vm965_vm2, %v2460_v50  ;;  %v1320_v9 = vadd.f32 %v1319_v28, %v1130_v63  ;;  %v1399_v28 = vpop.f32.mrf.mxu3  ;;  %v2918_v50 = vld [vmem:[%s3243_s24 + $0x214] sm:$0xf] }
 0x13e   : > { %v3453_v32 = vadd.f32 %v1399_v28, %v1210_v27 }
 0x13f   : > { %v1475_v0 = vmax.f32 %v1320_v9, 0.0  ;;  %1169 = vmatmul.bf16.gmra.mxu0 %v2448_v61 }
 0x141   : > { %v3433_v2 = vmax.f32 %v3367_v29, %v1475_v0  ;;  %v2917_v29 = vld [vmem:[%s3243_s24 + $0x204] sm:$0xf0]  ;;  %v2892_v0 = vld [vmem:[%s3243_s24 + $0x144] sm:$0xf] }
 0x142   : > { %v1326_v3 = vpop.f32.mrf.mxu1  ;;  %v2576_v20 = vor.u32 %v2917_v29, %v2575_v18  ;;  %v2920_v29 = vld [vmem:[%s3243_s24 + $0x224] sm:$0xf] }
 0x144   : > { %v1132_v4 = vpop.f32.mrf.mxu0  ;;  %1249 = vmatmul.bf16.gmra.mxu2 %v2576_v20  ;;  %v2593_v20 = vld [vmem:[%s3243_s24 + $0x228] sm:$0xf0] }
 0x145   : > { %v1322_v5 = vadd.f32 %v1321_v43, %v1132_v4  ;;  %v2889_v43 = vld [vmem:[%s3243_s24 + $0x124] sm:$0xf0]  ;;  %v3461_v44 = vpop.f32.mrf.mxu3  ;;  %v2596_v22 = vor.u32 %v2920_v29, %v2593_v20  ;;  %v2935_v29 = vld [vmem:[%s3878_s2 + $0x10] sm:$0xff] }
 0x146   : > { %v2464_v19 = vor.u32 %v2889_v43, %v2463_v41  ;;  %v2479_v41 = vld [vmem:[%s3243_s24 + $0x140] sm:$0xf]  ;;  %v2893_v43 = vld [vmem:[%s3243_s24 + $0x144] sm:$0xf0]  ;;  %1649 = vmatpush.bf16.msrb.mxu2 %v2935_v29 }
 0x147   : > { %v1476_v10 = vmax.f32 %v1322_v5, 0.0  ;;  %v3482_v5 = vpop.f32.mrf.mxu2 }
 0x149   : > { %v3442_v14 = vmax.f32 %v3374_v16, %v1476_v10  ;;  %v2891_v10 = vld [vmem:[%s3243_s24 + $0x134] sm:$0xf0] }
 0x14a   : > { %v1329_v17 = vpop.f32.mrf.mxu1  ;;  %v2472_v21 = vor.u32 %v2891_v10, %v2471_v8 }
 0x14c   : > { %v1135_v25 = vpop.f32.mrf.mxu0 }
 0x14d   : > { %2659 = vmatmul.msk.bf16.gmra.mxu1 %vm965_vm2, %v2468_v12  ;;  %v1325_v26 = vadd.f32 %v1324_v53, %v1135_v25  ;;  %v1404_v59 = vpop.f32.mrf.mxu3 }
 0x14e   : > { %v3478_v62 = vadd.f32 %v1404_v59, %v1215_v58 }
 0x14f   : > { %v1477_v16 = vmax.f32 %v1325_v26, 0.0  ;;  %1174 = vmatmul.bf16.gmra.mxu0 %v2456_v23  ;;  %v1220_v25 = vpop.f32.mrf.mxu2 }
 0x151   : > { %v3451_v30 = vmax.f32 %v3383_v54, %v1477_v16 }
 0x152   : > { %v1331_v31 = vpop.f32.mrf.mxu1 }
 0x154   : > { %v1137_v33 = vpop.f32.mrf.mxu0  ;;  %1254 = vmatmul.bf16.gmra.mxu2 %v2584_v49  ;;  %v2600_v49 = vor.u32 %v2923_v48, %v2599_v47 }
 0x155   : > { %v1327_v35 = vadd.f32 %v1326_v3, %v1137_v33  ;;  %v2481_v3 = vld [vmem:[%s3243_s24 + $0x148] sm:$0xf0]  ;;  %v3486_v12 = vpop.f32.mrf.mxu3 }
 0x156   : > { %v2484_v7 = vor.u32 %v2892_v0, %v2481_v3  ;;  %v2896_v3 = vld [vmem:[%s3243_s24 + $0x164] sm:$0xf] }
 0x157   : > { %v1478_v39 = vmax.f32 %v1327_v35, 0.0  ;;  %v2894_v35 = vld [vmem:[%s3243_s24 + $0x154] sm:$0xf] }
 0x159   : > { %v3464_v54 = vmax.f32 %v3390_v34, %v1478_v39  ;;  %v2588_v34 = vor.u32 %v2918_v50, %v2585_v51  ;;  %v3504_v39 = vpop.f32.mrf.mxu2  ;;  %v2922_v50 = vld [vmem:[%s3243_s24 + $0x234] sm:$0xf]  ;;  %v2480_v51 = vor.u32 %v2893_v43, %v2479_v41  ;;  %v2495_v41 = vld [vmem:[%s3243_s24 + $0x160] sm:$0xf]  ;;  %v2897_v43 = vld [vmem:[%s3243_s24 + $0x164] sm:$0xf0] }
 0x15a   : > { %v1334_v45 = vpop.f32.mrf.mxu1  ;;  %v2496_v48 = vor.u32 %v2897_v43, %v2495_v41 }
 0x15b   : > { %2674 = vmatmul.msk.bf16.gmra.mxu3 %vm965_vm2, %v2588_v34 }
 0x15c   : > { %v1140_v53 = vpop.f32.mrf.mxu0 }
 0x15d   : > { %2660 = vmatmul.msk.bf16.gmra.mxu1 %vm965_vm2, %v2476_v40  ;;  %v1330_v56 = vadd.f32 %v1329_v17, %v1140_v53  ;;  %v2921_v17 = vld [vmem:[%s3243_s24 + $0x224] sm:$0xf0]  ;;  %v1409_v26 = vpop.f32.mrf.mxu3  ;;  %v2492_v40 = vor.u32 %v2894_v35, %v2489_v36  ;;  %v2505_v35 = vld [vmem:[%s3243_s24 + $0x178] sm:$0xf0] }
 0x15e   : > { %v2592_v18 = vor.u32 %v2921_v17, %v2591_v13  ;;  %v3500_v28 = vadd.f32 %v1409_v26, %v1220_v25  ;;  %v2895_v13 = vld [vmem:[%s3243_s24 + $0x154] sm:$0xf0] }
 0x15f   : > { %v1479_v57 = vmax.f32 %v1330_v56, 0.0  ;;  %1179 = vmatmul.bf16.gmra.mxu0 %v2464_v19  ;;  %v2601_v19 = vld [vmem:[%s3243_s24 + $0x238] sm:$0xf0] }
 0x160   : > { %v2604_v53 = vor.u32 %v2922_v50, %v2601_v19 }
 0x161   : > { %v3476_v60 = vmax.f32 %v3399_v15, %v1479_v57  ;;  %v1225_v57 = vpop.f32.mrf.mxu2 }
 0x162   : > { %v1336_v61 = vpop.f32.mrf.mxu1 }
 0x164   : > { %v1142_v63 = vpop.f32.mrf.mxu0  ;;  %1259 = vmatmul.bf16.gmra.mxu2 %v2592_v18 }
 0x165   : > { %v1332_v9 = vadd.f32 %v1331_v31, %v1142_v63 }
 0x167   : > { %v1480_v4 = vmax.f32 %v1332_v9, 0.0 }
 0x169   : > { %v3489_v15 = vmax.f32 %v3406_v52, %v1480_v4  ;;  %v2497_v4 = vld [vmem:[%s3243_s24 + $0x168] sm:$0xf0]  ;;  %v3526_v8 = vpop.f32.mrf.mxu2 }
 0x16a   : > { %v1339_v37 = vpop.f32.mrf.mxu1  ;;  %v2500_v10 = vor.u32 %v2896_v3, %v2497_v4 }
 0x16b   : > { %2675 = vmatmul.msk.bf16.gmra.mxu3 %vm965_vm2, %v2596_v22 }
 0x16c   : > { %v1145_v23 = vpop.f32.mrf.mxu0 }
 0x16d   : > { %2661 = vmatmul.msk.bf16.gmra.mxu1 %vm965_vm2, %v2484_v7  ;;  %v1335_v24 = vadd.f32 %v1334_v45, %v1145_v23  ;;  %v3508_v45 = vpop.f32.mrf.mxu3 }
 0x16e   : > { %3879 = vst [vmem:[#allocation8_spill] sm:$0xff] %v3508_v45 }
 0x16f   : > { %v1481_v52 = vmax.f32 %v1335_v24, 0.0  ;;  %1184 = vmatmul.bf16.gmra.mxu0 %v2472_v21 }
 0x171   : > { %v3498_v16 = vmax.f32 %v3415_v42, %v1481_v52 }
 0x172   : > { %v1341_v27 = vpop.f32.mrf.mxu1 }
 0x173   : > { %v1230_v24 = vpop.f32.mrf.mxu2 }
 0x174   : > { %v1147_v31 = vpop.f32.mrf.mxu0  ;;  %1264 = vmatmul.bf16.gmra.mxu2 %v2600_v49 }
 0x175   : > { %v1337_v33 = vadd.f32 %v1336_v61, %v1147_v31  ;;  %v1414_v58 = vpop.f32.mrf.mxu3 }
 0x176   : > { %v3522_v63 = vadd.f32 %v1414_v58, %v1225_v57 }
 0x177   : > { %v1482_v38 = vmax.f32 %v1337_v33, 0.0  ;;  %v2898_v33 = vld [vmem:[%s3243_s24 + $0x174] sm:$0xf] }
 0x179   : > { %v3511_v42 = vmax.f32 %v3422_v6, %v1482_v38 }
 0x17a   : > { %v1344_v46 = vpop.f32.mrf.mxu1 }
 0x17b   : > { %2676 = vmatmul.msk.bf16.gmra.mxu3 %vm965_vm2, %v2604_v53  ;;  %v3546_v38 = vpop.f32.mrf.mxu2 }
 0x17c   : > { %v1150_v34 = vpop.f32.mrf.mxu0 }
 0x17d   : > { %2662 = vmatmul.msk.bf16.gmra.mxu1 %vm965_vm2, %v2492_v40  ;;  %v1340_v56 = vadd.f32 %v1339_v37, %v1150_v34  ;;  %v2487_v37 = vld [vmem:[%s3243_s24 + $0x150] sm:$0xf]  ;;  %v3530_v17 = vpop.f32.mrf.mxu3  ;;  %v2508_v40 = vor.u32 %v2898_v33, %v2505_v35  ;;  %s485_s24 = sand.u32 1, %s3080_s19  }
 0x17e   : > { %v2488_v20 = vor.u32 %v2895_v13, %v2487_v37  ;;  %s2245_s23 = scalar_lea.sflag [#allocation3], %s485_s24 }
 0x17f   : > { %v1483_v6 = vmax.f32 %v1340_v56, 0.0  ;;  %1189 = vmatmul.bf16.gmra.mxu0 %v2480_v51 }
 0x181   : > { %v3520_v59 = vmax.f32 %v3433_v2, %v1483_v6 }
 0x182   : > { %v1346_v61 = vpop.f32.mrf.mxu1 }
 0x183   : > { %v1235_v51 = vpop.f32.mrf.mxu2 }
 0x184   : > { %v1152_v9 = vpop.f32.mrf.mxu0 }
 0x185   : > { %v1342_v0 = vadd.f32 %v1341_v27, %v1152_v9 }
 0x187   : > { %v1484_v7 = vmax.f32 %v1342_v0, 0.0 }
 0x189   : > { %v3533_v18 = vmax.f32 %v3442_v14, %v1484_v7  ;;  %v1419_v14 = vpop.f32.mrf.mxu3 }
 0x18a   : > { %v1349_v2 = vpop.f32.mrf.mxu1  ;;  %v3542_v26 = vadd.f32 %v1419_v14, %v1230_v24 }
 0x18c   : > { %v1155_v21 = vpop.f32.mrf.mxu0 }
 0x18d   : > { %2663 = vmatmul.msk.bf16.gmra.mxu1 %vm965_vm2, %v2500_v10  ;;  %v1345_v22 = vadd.f32 %v1344_v46, %v1155_v21 }
 0x18f   : > { %v1485_v23 = vmax.f32 %v1345_v22, 0.0  ;;  %1194 = vmatmul.bf16.gmra.mxu0 %v2488_v20 }
 0x191   : > { %v3540_v52 = vmax.f32 %v3451_v30, %v1485_v23  ;;  %v3550_v46 = vpop.f32.mrf.mxu3 }
 0x192   : > { %v1351_v25 = vpop.f32.mrf.mxu1 }
 0x194   : > { %v1157_v27 = vpop.f32.mrf.mxu0 }
 0x195   : > { %v1347_v31 = vadd.f32 %v1346_v61, %v1157_v27 }
 0x197   : > { %v1486_v36 = vmax.f32 %v1347_v31, 0.0 }
 0x199   : > { %v3553_v47 = vmax.f32 %v3464_v54, %v1486_v36  ;;  %v1424_v53 = vpop.f32.mrf.mxu3  ;;  %v3559_v54 = vpop.f32.mrf.mxu2 }
 0x19a   : > { %v1354_v30 = vpop.f32.mrf.mxu1  ;;  %v3557_v6 = vadd.f32 %v1424_v53, %v1235_v51 }
 0x19c   : > { %v1160_v49 = vpop.f32.mrf.mxu0 }
 0x19d   : > { %2664 = vmatmul.msk.bf16.gmra.mxu1 %vm965_vm2, %v2508_v40  ;;  %v1350_v50 = vadd.f32 %v1349_v2, %v1160_v49  ;;  %v2934_v40 = vld [vmem:[%s3878_s2 + $0x8] sm:$0xff] }
 0x19e   : > { %1650 = vmatpush.bf16.msrb.mxu2 %v2934_v40 }
 0x19f   : > { %v1487_v19 = vmax.f32 %v1350_v50, 0.0  ;;  %1199 = vmatmul.bf16.gmra.mxu0 %v2496_v48 }
 0x1a1   : > { %v1551_v34 = vmax.f32 %v3476_v60, %v1487_v19  ;;  %v3561_v9 = vpop.f32.mrf.mxu3  ;;  %v1240_v37 = vpop.f32.mrf.mxu2 }
 0x1a2   : > { %v1356_v56 = vpop.f32.mrf.mxu1 }
 0x1a4   : > { %v1162_v57 = vpop.f32.mrf.mxu0 }
 0x1a5   : > { %v1352_v58 = vadd.f32 %v1351_v25, %v1162_v57 }
 0x1a7   : > { %v1488_v61 = vmax.f32 %v1352_v58, 0.0 }
 0x1a9   : > { %v3564_v0 = vmax.f32 %v3489_v15, %v1488_v61  ;;  %v1429_v13 = vpop.f32.mrf.mxu3  ;;  %v3569_v23 = vpop.f32.mrf.mxu2 }
 0x1aa   : > { %v1359_v3 = vpop.f32.mrf.mxu1  ;;  %v3567_v29 = vadd.f32 %v1429_v13, %v1240_v37  ;;  %3881 = vst [vmem:[#allocation10_spill] sm:$0xff] %v3569_v23 }
 0x1ab   : > { %3880 = vst [vmem:[#allocation9_spill] sm:$0xff] %v3564_v0 }
 0x1ac   : > { %v1165_v4 = vpop.f32.mrf.mxu0 }
 0x1ad   : > { %v1355_v7 = vadd.f32 %v1354_v30, %v1165_v4 }
 0x1af   : > { %v1489_v10 = vmax.f32 %v1355_v7, 0.0 }
 0x1b1   : > { %v1553_v60 = vmax.f32 %v3498_v16, %v1489_v10  ;;  %v3571_v24 = vpop.f32.mrf.mxu3  ;;  %v1245_v33 = vpop.f32.mrf.mxu2 }
 0x1b2   : > { %v1361_v2 = vpop.f32.mrf.mxu1  ;;  %3882 = vst [vmem:[#allocation11_spill] sm:$0xff] %v3571_v24 }
 0x1b4   : > { %v1167_v20 = vpop.f32.mrf.mxu0 }
 0x1b5   : > { %v1357_v21 = vadd.f32 %v1356_v56, %v1167_v20 }
 0x1b7   : > { %v1490_v22 = vmax.f32 %v1357_v21, 0.0 }
 0x1b9   : > { %v3574_v15 = vmax.f32 %v3511_v42, %v1490_v22  ;;  %v1434_v35 = vpop.f32.mrf.mxu3  ;;  %v3584_v50 = vpop.f32.mrf.mxu2 }
 0x1ba   : > { %v1364_v14 = vpop.f32.mrf.mxu1  ;;  %v3582_v41 = vadd.f32 %v1434_v35, %v1245_v33 }
 0x1bc   : > { %v1170_v25 = vpop.f32.mrf.mxu0 }
 0x1bd   : > { %v1360_v27 = vadd.f32 %v1359_v3, %v1170_v25  ;;  %v2933_v25 = vld [vmem:[%s3878_s2] sm:$0xff] }
 0x1be   : > { %1651 = vmatpush.bf16.msrb.mxu2 %v2933_v25  ;;  %v1515_v25 = vmax.f32 %v3542_v26, 0.0 }
 0x1bf   : > { %v1491_v31 = vmax.f32 %v1360_v27, 0.0 }
 0x1c1   : > { %v1555_v16 = vmax.f32 %v3520_v59, %v1491_v31  ;;  %v3591_v51 = vpop.f32.mrf.mxu3 }
 0x1c2   : > { %v3577_v36 = vpop.f32.mrf.mxu1 }
 0x1c4   : > { %v1172_v43 = vpop.f32.mrf.mxu0 }
 0x1c7   : > { %v1250_v57 = vpop.f32.mrf.mxu2 }
 0x1c9   : > { %v1439_v58 = vpop.f32.mrf.mxu3 }
 0x1ca   : > { %v1369_v42 = vpop.f32.mrf.mxu1 }
 0x1cc   : > { %v1175_v30 = vpop.f32.mrf.mxu0 }
 0x1cd   : > { %v1365_v48 = vadd.f32 %v1364_v14, %v1175_v30 }
 0x1cf   : > { %v1493_v49 = vmax.f32 %v1365_v48, 0.0  ;;  %v1252_v13 = vpop.f32.mrf.mxu2 }
 0x1d1   : > { %v3587_v19 = vmax.f32 %v3540_v52, %v1493_v49  ;;  %v1441_v52 = vpop.f32.mrf.mxu3 }
 0x1d2   : > { %v3589_v59 = vpop.f32.mrf.mxu1 }
 0x1d4   : > { %v1177_v53 = vpop.f32.mrf.mxu0 }
 0x1d7   : > { %v3599_v14 = vpop.f32.mrf.mxu2 }
 0x1da   : > { %v1374_v56 = vpop.f32.mrf.mxu1 }
 0x1dc   : > { %v1180_v61 = vpop.f32.mrf.mxu0 }
 0x1dd   : > { %v1370_v3 = vadd.f32 %v1369_v42, %v1180_v61 }
 0x1de   : > { %v3604_v31 = vpop.f32.mrf.mxu3 }
 0x1df   : > { %v1495_v4 = vmax.f32 %v1370_v3, 0.0  ;;  %v1257_v40 = vpop.f32.mrf.mxu2  ;;  %v2937_v3 = vld [vmem:[%s3852_s3] sm:$0xff] }
 0x1e0   : > { %1745 = vmatpush.bf16.msrb.mxu3 %v2937_v3 }
 0x1e1   : > { %v3593_v7 = vmax.f32 %v1551_v34, %v1495_v4  ;;  %v1507_v4 = vmax.f32 %v3453_v32, 0.0  ;;  %v1422_v32 = vadd.f32 %v3550_v46, %v3546_v38  ;;  %v1367_v38 = vadd.f32 %v3577_v36, %v1177_v53 }
 0x1e2   : > { %v3595_v10 = vpop.f32.mrf.mxu1 }
 0x1e4   : > { %v3597_v37 = vpop.f32.mrf.mxu0 }
 0x1e6   : > { %v1446_v30 = vpop.f32.mrf.mxu3 }
 0x1ea   : > { %v1379_v20 = vpop.f32.mrf.mxu1 }
 0x1ec   : > { %v1185_v21 = vpop.f32.mrf.mxu0 }
 0x1ed   : > { %v1375_v22 = vadd.f32 %v1374_v56, %v1185_v21  ;;  %v1362_v56 = vadd.f32 %v1361_v2, %v1172_v43  ;;  %v1402_v2 = vadd.f32 %v3461_v44, %v3457_v55 }
 0x1ee   : > { %v3617_v24 = vpop.f32.mrf.mxu3 }
 0x1ef   : > { %v1497_v27 = vmax.f32 %v1375_v22, 0.0  ;;  %3884 = vst [vmem:[#allocation13_spill] sm:$0xff] %v3617_v24  ;;  %v1508_v3 = vmax.f32 %v1402_v2, 0.0 }
 0x1f1   : > { %v3606_v34 = vmax.f32 %v1553_v60, %v1497_v27  ;;  %v3614_v60 = vpop.f32.mrf.mxu2  ;;  %v1492_v27 = vmax.f32 %v1362_v56, 0.0 }
 0x1f2   : > { %v1381_v33 = vpop.f32.mrf.mxu1  ;;  %3883 = vst [vmem:[#allocation12_spill] sm:$0xff] %v3614_v60  ;;  %v1442_v60 = vadd.f32 %v1441_v52, %v1252_v13 }
 0x1f4   : > { %v3608_v35 = vpop.f32.mrf.mxu0  ;;  %v1524_v55 = vmax.f32 %v1442_v60, 0.0 }
 0x1f9   : > { %v3624_v45 = vpop.f32.mrf.mxu2 }
 0x1fa   : > { %v1384_v42 = vpop.f32.mrf.mxu1 }
 0x1fc   : > { %v1190_v48 = vpop.f32.mrf.mxu0 }
 0x1fd   : > { %v1380_v49 = vadd.f32 %v1379_v20, %v1190_v48 }
 0x1ff   : > { %v1499_v61 = vmax.f32 %v1380_v49, 0.0  ;;  %v1440_v49 = vadd.f32 %v1439_v58, %v1250_v57  ;;  %v1509_v58 = vmax.f32 %v3478_v62, 0.0  ;;  %v1427_v62 = vadd.f32 %v3561_v9, %v3559_v54 }
 0x201   : > { %v1563_v21 = vmax.f32 %v1555_v16, %v1499_v61  ;;  %v1556_v16 = vmax.f32 %v3533_v18, %v1492_v27  ;;  %v1517_v27 = vmax.f32 %v3557_v6, 0.0 }
 0x202   : > { %v1386_v22 = vpop.f32.mrf.mxu1 }
 0x203   : > { %v1571_v0 = vmax.f32 %v1563_v21, %v1507_v4  ;;  %v1516_v4 = vmax.f32 %v1422_v32, 0.0  ;;  %v1523_v21 = vmax.f32 %v1440_v49, 0.0  ;;  %v1447_v32 = vadd.f32 %v1446_v30, %v1257_v40 }
 0x204   : > { %v1192_v20 = vpop.f32.mrf.mxu0  ;;  %v1372_v40 = vadd.f32 %v3589_v59, %v3597_v37  ;;  %v1519_v37 = vmax.f32 %v3567_v29, 0.0 }
 0x205   : > { %v1579_v43 = vmax.f32 %v1571_v0, %v1515_v25  ;;  %v1382_v48 = vadd.f32 %v1381_v33, %v1192_v20  ;;  %v3626_v33 = vpop.f32.mrf.mxu3  ;;  %v1494_v20 = vmax.f32 %v1367_v38, 0.0 }
 0x207   : > { %v1500_v61 = vmax.f32 %v1382_v48, 0.0  ;;  %v1587_v18 = vmax.f32 %v1579_v43, %v1523_v21  ;;  %v1558_v2 = vmax.f32 %v3553_v47, %v1494_v20  ;;  %v1526_v47 = vmax.f32 %v1447_v32, 0.0 }
 0x209   : > { %v1564_v26 = vmax.f32 %v1556_v16, %v1500_v61 }
 0x20a   : > { %v1389_v56 = vpop.f32.mrf.mxu1 }
 0x20b   : > { %v1572_v24 = vmax.f32 %v1564_v26, %v1508_v3  ;;  %v1377_v3 = vadd.f32 %v3595_v10, %v3608_v35  ;;  %v1511_v35 = vmax.f32 %v3500_v28, 0.0 }
 0x20c   : > { %v1195_v23 = vpop.f32.mrf.mxu0 }
 0x20d   : > { %v1580_v44 = vmax.f32 %v1572_v24, %v1516_v4  ;;  %v1385_v0 = vadd.f32 %v1384_v42, %v1195_v23  ;;  %v1407_v24 = vadd.f32 %v3486_v12, %v3482_v5  ;;  %v1265_v42 = vpop.f32.mrf.mxu2  ;;  %v1454_v43 = vpop.f32.mrf.mxu3  ;;  %v1518_v5 = vmax.f32 %v1427_v62, 0.0  ;;  %v3890_v62 = vld [vmem:[#allocation13_spill] sm:$0xff] }
 0x20f   : > { %v1588_v46 = vmax.f32 %v1580_v44, %v1524_v55  ;;  %v1501_v57 = vmax.f32 %v1385_v0, 0.0  ;;  %v1510_v48 = vmax.f32 %v1407_v24, 0.0  ;;  %v1521_v55 = vmax.f32 %v3582_v41, 0.0  ;;  %v3887_v24 = vld [vmem:[#allocation11_spill] sm:$0xff] }
 0x210   : > { %v1498_v44 = vmax.f32 %v1377_v3, 0.0  ;;  %v1437_v41 = vadd.f32 %v3591_v51, %v3584_v50  ;;  %v3888_v50 = vld [vmem:[#allocation9_spill] sm:$0xff] }
 0x211   : > { %v1595_v13 = vpack.c.bf16 %v1588_v46, %v1587_v18  ;;  %v1565_v52 = vmax.f32 %v3587_v19, %v1501_v57  ;;  %v1445_v19 = vadd.f32 %v3604_v31, %v3599_v14  ;;  %v1513_v14 = vmax.f32 %v3522_v63, 0.0 }
 0x212   : > { %v1391_v25 = vpop.f32.mrf.mxu1  ;;  %v1496_v57 = vmax.f32 %v1372_v40, 0.0  ;;  %v1562_v28 = vmax.f32 %v3574_v15, %v1498_v44 }
 0x213   : > { %v1573_v60 = vmax.f32 %v1565_v52, %v1509_v58  ;;  %2693 = vmatmul.msk.bf16.vlgmr.msrb.gmra.mxu2 %vm1631_vm3, %v1595_v13  ;;  %v1525_v12 = vmax.f32 %v1445_v19, 0.0 }
 0x214   : > { %v1197_v23 = vpop.f32.mrf.mxu0  ;;  %v1560_v51 = vmax.f32 %v3888_v50, %v1496_v57 }
 0x215   : > { %v1581_v36 = vmax.f32 %v1573_v60, %v1517_v27  ;;  %v1387_v53 = vadd.f32 %v1386_v22, %v1197_v23  ;;  %v1267_v10 = vpop.f32.mrf.mxu2  ;;  %v1456_v63 = vpop.f32.mrf.mxu3  ;;  %v3886_v23 = vld [vmem:[#allocation10_spill] sm:$0xff] }
 0x216   : > { %v1457_v27 = vadd.f32 %v1456_v63, %v1267_v10 }
 0x217   : > { %v1502_v6 = vmax.f32 %v1387_v53, 0.0  ;;  %v1589_v30 = vmax.f32 %v1581_v36, %v1525_v12  ;;  %v1432_v36 = vadd.f32 %v3887_v24, %v3886_v23  ;;  %v3889_v53 = vld [vmem:[#allocation12_spill] sm:$0xff] }
 0x219   : > { %v1566_v16 = vmax.f32 %v1558_v2, %v1502_v6  ;;  %v1450_v2 = vadd.f32 %v3890_v62, %v3889_v53 }
 0x21a   : > { %v1394_v49 = vpop.f32.mrf.mxu1 }
 0x21b   : > { %v1395_v61 = vadd.f32 %v1394_v49, %v3430_v1  ;;  %v1574_v22 = vmax.f32 %v1566_v16, %v1510_v48  ;;  %v1520_v16 = vmax.f32 %v1432_v36, 0.0  ;;  %v1527_v49 = vmax.f32 %v1450_v2, 0.0 }
 0x21c   : > { %v1200_v9 = vpop.f32.mrf.mxu0 }
 0x21d   : > { %v1505_v54 = vmax.f32 %v1395_v61, 0.0  ;;  %v1582_v26 = vmax.f32 %v1574_v22, %v1518_v5  ;;  %v1390_v4 = vadd.f32 %v1389_v56, %v1200_v9 }
 0x21f   : > { %v1569_v31 = vmax.f32 %v3606_v34, %v1505_v54  ;;  %v1590_v1 = vmax.f32 %v1582_v26, %v1526_v47  ;;  %v1503_v21 = vmax.f32 %v1390_v4, 0.0  ;;  %v1417_v34 = vadd.f32 %v3530_v17, %v3526_v8  ;;  %v3885_v8 = vld [vmem:[#allocation8_spill] sm:$0xff] }
 0x220   : > { %v1412_v17 = vadd.f32 %v3885_v8, %v3504_v39  ;;  %v1452_v39 = vadd.f32 %v3626_v33, %v3624_v45 }
 0x221   : > { %v1577_v0 = vmax.f32 %v1569_v31, %v1513_v14  ;;  %v1567_v38 = vmax.f32 %v3593_v7, %v1503_v21  ;;  %v1596_v18 = vpack.c.bf16 %v1590_v1, %v1589_v30  ;;  %v1455_v7 = vadd.f32 %v1454_v43, %v1265_v42 }
 0x222   : > { %v1396_v56 = vpop.f32.mrf.mxu1  ;;  %v1514_v60 = vmax.f32 %v1417_v34, 0.0  ;;  %v1522_v42 = vmax.f32 %v1437_v41, 0.0  ;;  %v1530_v43 = vmax.f32 %v1457_v27, 0.0  ;;  %v1512_v48 = vmax.f32 %v1412_v17, 0.0 }
 0x223   : > { %v1585_v46 = vmax.f32 %v1577_v0, %v1521_v55  ;;  %v1397_v59 = vadd.f32 %v1396_v56, %v3437_v11  ;;  %v1575_v58 = vmax.f32 %v1567_v38, %v1511_v35  ;;  %2694 = vmatmul.msk.bf16.gmra.mxu2 %vm1631_vm3, %v1596_v18  ;;  %v1529_v19 = vmax.f32 %v1455_v7, 0.0 }
 0x224   : > { %v1202_v52 = vpop.f32.mrf.mxu0  ;;  %v1528_v22 = vmax.f32 %v1452_v39, 0.0 }
 0x225   : > { %v1506_v13 = vmax.f32 %v1397_v59, 0.0  ;;  %v1583_v20 = vmax.f32 %v1575_v58, %v1519_v37  ;;  %v1392_v11 = vadd.f32 %v1391_v25, %v1202_v52  ;;  %v1593_v5 = vmax.f32 %v1585_v46, %v1529_v19  ;;  %v2939_v52 = vld [vmem:[%s3853_s4] sm:$0xff] }
 0x226   : > { %1822 = vmatpush.bf16.msra.mxu2 %v2939_v52  ;;  %v2955_v52 = vld [vmem:[%s3857_s8 + $0x34] sm:$0xf0] }
 0x227   : > { %v1570_v29 = vmax.f32 %v1562_v28, %v1506_v13  ;;  %v1504_v15 = vmax.f32 %v1392_v11, 0.0  ;;  %v1591_v9 = vmax.f32 %v1583_v20, %v1527_v49 }
 0x229   : > { %v1578_v6 = vmax.f32 %v1570_v29, %v1514_v60  ;;  %v1568_v25 = vmax.f32 %v1560_v51, %v1504_v15 }
 0x22b   : > { %v1586_v32 = vmax.f32 %v1578_v6, %v1522_v42  ;;  %v1576_v61 = vmax.f32 %v1568_v25, %v1512_v48 }
 0x22d   : > { %v1594_v12 = vmax.f32 %v1586_v32, %v1530_v43  ;;  %v1584_v3 = vmax.f32 %v1576_v61, %v1520_v16 }
 0x22f   : > { %v1598_v54 = vpack.c.bf16 %v1594_v12, %v1593_v5  ;;  %v1592_v47 = vmax.f32 %v1584_v3, %v1528_v22  ;;  %v2938_v12 = vld [vmem:[%s3859_s10] sm:$0xff] }
 0x231   : > { %v1597_v26 = vpack.c.bf16 %v1592_v47, %v1591_v9  ;;  %v2941_v9 = vld [vmem:[%s3854_s5 + $0x8] sm:$0xff]  ;;  %v2940_v47 = vld [vmem:[%s3854_s5] sm:$0xff] }
 0x233   : > { %2695 = vmatmul.msk.bf16.gmra.mxu2 %vm1631_vm3, %v1597_v26 }
 0x243   : > { %2696 = vmatmul.msk.bf16.gmra.mxu2 %vm1631_vm3, %v1598_v54 }
 0x296   : > { %v1653_v4 = vpop.f32.mrf.mxu2 }
 0x297   : > { %v1673_v45 = vmax.f32 %v1653_v4, 0.0 }
 0x29e   : > { %v1655_v14 = vpop.f32.mrf.mxu2 }
 0x29f   : > { %v1674_v33 = vmax.f32 %v1655_v14, 0.0 }
 0x2a1   : > { %v1681_v31 = vpack.c.bf16 %v1674_v33, %v1673_v45 }
 0x2a3   : > { %2701 = vmatmul.msk.bf16.vlgmr.msrb.gmra.mxu3 %vm1725_vm4, %v1681_v31  ;;  %v2943_v31 = vld [vmem:[%s3855_s6 + $0x8] sm:$0xff] }
 0x2a6   : > { %v1658_v40 = vpop.f32.mrf.mxu2 }
 0x2a7   : > { %1705 = vrot.lane.b32.xlu2 %v1658_v40, %s3091_s27  ;;  %v1675_v1 = vmax.f32 %v1658_v40, 0.0 }
 0x2ae   : > { %v1660_v30 = vpop.f32.mrf.mxu2 }
 0x2af   : > { %v1676_v21 = vmax.f32 %v1660_v30, 0.0  ;;  %1707 = vrot.lane.b32.xlu2 %v1660_v30, %s3091_s27 }
 0x2b1   : > { %v1682_v55 = vpack.c.bf16 %v1676_v21, %v1675_v1 }
 0x2b3   : > { %2702 = vmatmul.msk.bf16.gmra.mxu3 %vm1725_vm4, %v1682_v55 }
 0x2b6   : > { %v1663_v44 = vpop.f32.mrf.mxu2 }
 0x2b7   : > { %1709 = vrot.lane.b32.xlu1 %v1663_v44, %s3091_s27  ;;  %v1677_v10 = vmax.f32 %v1663_v44, 0.0 }
 0x2be   : > { %v1665_v0 = vpop.f32.mrf.mxu2 }
 0x2bf   : > { %v1678_v35 = vmax.f32 %v1665_v0, 0.0  ;;  %1711 = vrot.lane.b32.xlu1 %v1665_v0, %s3091_s27 }
 0x2c1   : > { %v1683_v38 = vpack.c.bf16 %v1678_v35, %v1677_v10 }
 0x2c3   : > { %2703 = vmatmul.msk.bf16.gmra.mxu3 %vm1725_vm4, %v1683_v38  ;;  %v1876_v38 = vld [vmem:[%s3860_s11] sm:$0x3] }
 0x2c6   : > { %v1668_v56 = vpop.f32.mrf.mxu2 }
 0x2c7   : > { %1703 = vrot.lane.b32.xlu1 %v1655_v14, %s3091_s27  ;;  %1713 = vrot.lane.b32.xlu0 %v1668_v56, %s3091_s27  ;;  %v1679_v63 = vmax.f32 %v1668_v56, 0.0  ;;  %v2942_v56 = vld [vmem:[%s3855_s6] sm:$0xff] }
 0x2ce   : > { %v1670_v18 = vpop.f32.mrf.mxu2 }
 0x2cf   : > { %v1680_v34 = vmax.f32 %v1670_v18, 0.0  ;;  %1715 = vrot.lane.b32.xlu0 %v1670_v18, %s3091_s27  ;;  %v2947_v18 = vld [vmem:[%s3856_s7 + $0x18] sm:$0xff] }
 0x2d1   : > { %v1684_v46 = vpack.c.bf16 %v1680_v34, %v1679_v63  ;;  %v2946_v63 = vld [vmem:[%s3856_s7 + $0x10] sm:$0xff]  ;;  %v2945_v34 = vld [vmem:[%s3856_s7 + $0x8] sm:$0xff] }
 0x2d3   : > { %2704 = vmatmul.msk.bf16.gmra.mxu3 %vm1725_vm4, %v1684_v46 }
 0x2d7   : > { %1701 = vrot.lane.b32.xlu0 %v1653_v4, %s3091_s27  ;;  %s3092_s27 = smov 96  }
 0x301   : > { %v1706_v8 = vpop.permute.xlu2 %1705 }
 0x309   : > { %v1708_v51 = vpop.permute.xlu2 %1707 }
 0x326   : > { %v1747_v59 = vpop.f32.mrf.mxu3 }
 0x329   : > { %v1710_v13 = vpop.permute.xlu1 %1709 }
 0x32e   : > { %v1749_v37 = vpop.f32.mrf.mxu3 }
 0x331   : > { %v1712_v20 = vpop.permute.xlu1 %1711 }
 0x336   : > { %v1752_v57 = vpop.f32.mrf.mxu3 }
 0x337   : > { %v1753_v42 = vadd.f32 %v1752_v57, %v1706_v8  ;;  %v2944_v57 = vld [vmem:[%s3856_s7] sm:$0xff] }
 0x339   : > { %v1714_v7 = vpop.permute.xlu0 %1713  ;;  %v1704_v6 = vpop.permute.xlu1 %1703  ;;  %v1769_v25 = vmax.f32 %v1753_v42, 0.0  ;;  %v2780_v42 = vld [vmem:[%s3857_s8 + $0x38] sm:$0xf0] }
 0x33a   : > { %v1750_v32 = vadd.f32 %v1749_v37, %v1704_v6  ;;  %v2952_v6 = vld [vmem:[%s3857_s8 + $0x24] sm:$0xf] }
 0x33c   : > { %v1768_v61 = vmax.f32 %v1750_v32, 0.0 }
 0x33e   : > { %v1754_v41 = vpop.f32.mrf.mxu3 }
 0x33f   : > { %v1755_v53 = vadd.f32 %v1754_v41, %v1708_v51 }
 0x341   : > { %v1716_v17 = vpop.permute.xlu0 %1715  ;;  %v1770_v43 = vmax.f32 %v1755_v53, 0.0 }
 0x343   : > { %v1778_v16 = vpack.c.bf16 %v1770_v43, %v1769_v25  ;;  %v2772_v43 = vld [vmem:[%s3857_s8 + $0x28] sm:$0xf0]  ;;  %v2764_v25 = vld [vmem:[%s3857_s8 + $0x18] sm:$0xf0] }
 0x346   : > { %v1757_v58 = vpop.f32.mrf.mxu3 }
 0x347   : > { %v1758_v24 = vadd.f32 %v1757_v58, %v1710_v13  ;;  %v2778_v13 = vld [vmem:[%s3857_s8 + $0x30] sm:$0xf] }
 0x348   : > { %v2779_v8 = vor.u32 %v2955_v52, %v2778_v13 }
 0x349   : > { %v1702_v15 = vpop.permute.xlu0 %1701  ;;  %v1771_v19 = vmax.f32 %v1758_v24, 0.0 }
 0x34a   : > { %v1748_v48 = vadd.f32 %v1747_v59, %v1702_v15  ;;  %v2954_v15 = vld [vmem:[%s3857_s8 + $0x34] sm:$0xf] }
 0x34c   : > { %v1767_v49 = vmax.f32 %v1748_v48, 0.0  ;;  %v2775_v48 = vor.u32 %v2952_v6, %v2772_v43 }
 0x34e   : > { %v1759_v28 = vpop.f32.mrf.mxu3  ;;  %v1777_v5 = vpack.c.bf16 %v1768_v61, %v1767_v49  ;;  %v2949_v49 = vld [vmem:[%s3857_s8 + $0x4] sm:$0xf0]  ;;  %v2948_v61 = vld [vmem:[%s3857_s8 + $0x4] sm:$0xf] }
 0x34f   : > { %v1760_v29 = vadd.f32 %v1759_v28, %v1712_v20 }
 0x351   : > { %v1772_v62 = vmax.f32 %v1760_v29, 0.0 }
 0x353   : > { %v1779_v39 = vpack.c.bf16 %v1772_v62, %v1771_v19  ;;  %v1982_v62 = vld [vmem:[%s3861_s12] sm:$0x1]  ;;  %v2783_v19 = vor.u32 %v2954_v15, %v2780_v42 }
 0x356   : > { %v1762_v27 = vpop.f32.mrf.mxu3 }
 0x357   : > { %v1763_v11 = vadd.f32 %v1762_v27, %v1714_v7  ;;  %v2770_v27 = vld [vmem:[%s3857_s8 + $0x20] sm:$0xf] }
 0x359   : > { %v1773_v36 = vmax.f32 %v1763_v11, 0.0  ;;  %v2762_v11 = vld [vmem:[%s3857_s8 + $0x10] sm:$0xf] }
 0x35e   : > { %v1764_v60 = vpop.f32.mrf.mxu3 }
 0x35f   : > { %v1765_v23 = vadd.f32 %v1764_v60, %v1716_v17  ;;  %v2953_v17 = vld [vmem:[%s3857_s8 + $0x24] sm:$0xf0]  ;;  %v2951_v60 = vld [vmem:[%s3857_s8 + $0x14] sm:$0xf0] }
 0x360   : > { %v2771_v20 = vor.u32 %v2953_v17, %v2770_v27  ;;  %v2763_v29 = vor.u32 %v2951_v60, %v2762_v11 }
 0x361   : > { %v1774_v50 = vmax.f32 %v1765_v23, 0.0 }
 0x363   : > { %v1780_v2 = vpack.c.bf16 %v1774_v50, %v1773_v36 }
 0x365   : > { %1793 = vmatpush.bf16.msra.mxu3 %v1780_v2 }
 0x369   : > { %1794 = vmatpush.bf16.msra.mxu3 %v1779_v39  ;;  %v2950_v39 = vld [vmem:[%s3857_s8 + $0x14] sm:$0xf] }
 0x36a   : > { %v2767_v32 = vor.u32 %v2950_v39, %v2764_v25 }
 0x36d   : > { %1795 = vmatpush.bf16.msra.mxu3 %v1778_v16  ;;  %v2754_v16 = vld [vmem:[%s3857_s8] sm:$0xf] }
 0x371   : > { %1796 = vmatpush.bf16.msra.mxu3 %v1777_v5  ;;  %v2755_v5 = vor.u32 %v2949_v49, %v2754_v16 }
 0x374   : > { %2709 = vmatmul.msk.bf16.vlgmr.msra.gmra.mxu3 %vm1631_vm3, %v2938_v12  ;;  %v2756_v12 = vld [vmem:[%s3857_s8 + $0x8] sm:$0xf0] }
 0x375   : > { %1866 = vmatpush.bf16.msrb.mxu3 %v2941_v9  ;;  %v2961_v9 = vld [vmem:[%s3858_s9 + $0x28] sm:$0xff] }
 0x379   : > { %1867 = vmatpush.bf16.msrb.mxu3 %v2940_v47  ;;  %v2960_v47 = vld [vmem:[%s3858_s9 + $0x20] sm:$0xff] }
 0x37d   : > { %1920 = vmatpush.bf16.msra.mxu3 %v2943_v31 }
 0x381   : > { %1921 = vmatpush.bf16.msra.mxu3 %v2942_v56 }
 0x3f7   : > { %v1798_v22 = vpop.f32.mrf.mxu3 }
 0x3ff   : > { %v1800_v3 = vpop.f32.mrf.mxu3 }
 0x400   : > { %v1803_v54 = vpack.c.bf16 %v1800_v3, %v1798_v22  ;;  %v2759_v22 = vor.u32 %v2948_v61, %v2756_v12  ;;  %v2963_v3 = vld [vmem:[%s3858_s9 + $0x38] sm:$0xff] }
 0x402   : > { %2714 = vmatmul.msk.bf16.vlgmr.msra.gmra.mxu2 %vm1725_vm4, %v1803_v54  ;;  %v2962_v54 = vld [vmem:[%s3858_s9 + $0x30] sm:$0xff] }
 0x485   : > { %v1824_v26 = vpop.f32.mrf.mxu2 }
 0x486   : > { %1850 = vrot.lane.b32.xlu2 %v1824_v26, %s3092_s27  ;;  %v1829_v14 = vmax.f32 %v1824_v26, 0.0  ;;  %v2959_v26 = vld [vmem:[%s3858_s9 + $0x18] sm:$0xff] }
 0x48d   : > { %v1826_v4 = vpop.f32.mrf.mxu2 }
 0x48e   : > { %v1830_v45 = vmax.f32 %v1826_v4, 0.0  ;;  %1852 = vrot.lane.b32.xlu0 %v1826_v4, %s3092_s27  ;;  %v2958_v4 = vld [vmem:[%s3858_s9 + $0x10] sm:$0xff]  ;;  %s486_s27 = scalar_lea.vmem [#allocation2], %s485_s24 }
 0x48f   : > { %s2255_s16 = sshll.u32 %s486_s27, 4  ;;  %s2256_s16 = int_to_ptr.vmem [resolvable:$true] %s2255_s16 }
 0x490   : > { %v1831_v33 = vpack.c.bf16 %v1830_v45, %v1829_v14  ;;  %v2957_v14 = vld [vmem:[%s3858_s9 + $0x8] sm:$0xff] }
 0x492   : > { %2723 = vmatmul.msk.bf16.vlgmr.msrb.gmra.mxu3 %vm1856_vm5, %v1831_v33 }
 0x4e0   : > { %v1851_v30 = vpop.permute.xlu2 %1850 }
 0x500   : > { %v1853_v21 = vpop.permute.xlu0 %1852 }
 0x515   : > { %v1869_v40 = vpop.f32.mrf.mxu3 }
 0x516   : > { %v1870_v1 = vadd.f32 %v1869_v40, %v1851_v30  ;;  %v2956_v40 = vld [vmem:[%s3858_s9] sm:$0xff]  ;;  %v2971_v30 = vld [vmem:[%s3862_s13 + $0x38] sm:$0xff] }
 0x518   : > { %v1874_v0 = vmax.f32 %v1870_v1, 0.0  ;;  %v2970_v1 = vld [vmem:[%s3862_s13 + $0x30] sm:$0xff] }
 0x51d   : > { %v1871_v55 = vpop.f32.mrf.mxu3 }
 0x51e   : > { %v1872_v44 = vadd.f32 %v1871_v55, %v1853_v21  ;;  %v2969_v21 = vld [vmem:[%s3862_s13 + $0x28] sm:$0xff]  ;;  %v2968_v55 = vld [vmem:[%s3862_s13 + $0x20] sm:$0xff] }
 0x520   : > { %v1875_v10 = vmax.f32 %v1872_v44, 0.0  ;;  %v2967_v44 = vld [vmem:[%s3862_s13 + $0x18] sm:$0xff] }
 0x522   : > { %v1877_v35 = vpack.c.bf16 %v1875_v10, %v1874_v0  ;;  %v2966_v0 = vld [vmem:[%s3862_s13 + $0x10] sm:$0xff] }
 0x524   : > { %1888 = vmatpush.bf16.msrb.mxu2 %v1877_v35 }
 0x527   : > { %2724 = vmatmul.msk.bf16.vlgmr.msrb.gmra.mxu2 %vm1725_vm4, %v1876_v38 }
 0x528   : > { %1972 = vmatpush.bf16.msra.mxu2 %v2947_v18 }
 0x52c   : > { %1973 = vmatpush.bf16.msra.mxu2 %v2946_v63 }
 0x530   : > { %1974 = vmatpush.bf16.msra.mxu2 %v2945_v34  ;;  %v2965_v34 = vld [vmem:[%s3862_s13 + $0x8] sm:$0xff] }
 0x534   : > { %1975 = vmatpush.bf16.msra.mxu2 %v2944_v57 }
 0x538   : > { %2060 = vmatpush.bf16.msrb.mxu2 %v2779_v8 }
 0x53c   : > { %2061 = vmatpush.bf16.msrb.mxu2 %v2771_v20 }
 0x540   : > { %2062 = vmatpush.bf16.msrb.mxu2 %v2763_v29 }
 0x544   : > { %2063 = vmatpush.bf16.msrb.mxu2 %v2755_v5 }
 0x5aa   : > { %v1890_v46 = vpop.f32.mrf.mxu2 }
 0x5ab   : > { %v1894_v59 = vpack.c.bf16 %v1890_v46, %v1890_v46  ;;  %v2964_v46 = vld [vmem:[%s3862_s13] sm:$0xff] }
 0x5ad   : > { %2733 = vmatmul.msk.bf16.vlgmr.msra.gmra.mxu3 %vm1856_vm5, %v1894_v59 }
 0x5b2   : > { %v1892_v37 = vpop.f32.mrf.mxu2 }
 0x630   : > { %v1923_v41 = vpop.f32.mrf.mxu3 }
 0x631   : > { %v1927_v58 = vmax.f32 %v1923_v41, 0.0  ;;  %1962 = vrot.lane.b32.xlu1 %v1923_v41, %s3093_s30  ;;  %s2253_s30 = scalar_lea.hbm %s3864_s15, %s3195_s22 }
 0x632   : > { %s2257_s0 = sshll.u32 %s2253_s30, 4  ;;  %s2258_s0 = int_to_ptr.hbm [resolvable:$true] %s2257_s0 }
 0x633   : > { %v1928_v28 = vpack.c.bf16 %v1927_v58, %v1927_v58  ;;  %s3040_s1 = sshra.s32 %s2258_s0, 4  ;;  %s3041_s1 = int_to_ptr.hbm [resolvable:$true] %s3040_s1 }
 0x634   : > { %s3042_s2 = scalar_lea.hbm %s3041_s1, 1  ;;  %p3047_p0 = scmp.lt.s32.totalorder %s3041_s1, %s3864_s15 }
 0x635   : > { %2750 = vmatmul.msk.bf16.vlgmr.msra.gmra.mxu2 %vm1631_vm3, %v1928_v28  ;;  %v2180_v28 = vld [vmem:[%s3863_s14] sm:$0x1]  ;;  %p3043_p11 = scmp.ne.s32.totalorder %s3041_s1, %s3042_s2  ;;  %p3048_p1 = scmp.lt.s32.totalorder %s3046_s26, %s3042_s2 }
 0x636   : > { %2148 = vmatpush.bf16.msra.mxu2 %v2963_v3 }
 0x637   : > { %p3044_p12 = pnand %p3043_p11, %p3212_p5  ;;  %p3049_p2 = por %p3048_p1, %p3047_p0 }
 0x638   : > { %v1925_v7 = vpop.f32.mrf.mxu3 }
 0x639   : > { %p3045_p13 = pneg %p3044_p12 }
 0x63a   : > { %2149 = vmatpush.bf16.msra.mxu2 %v2962_v54 }
 0x63b   : > { %p3050_p3 = pnand %p3049_p2, %p3045_p13 }
 0x63e   : > { %2150 = vmatpush.bf16.msra.mxu2 %v2961_v9 }
 0x642   : > { %2151 = vmatpush.bf16.msra.mxu2 %v2960_v47 }
 0x646   : > { %2152 = vmatpush.bf16.msra.mxu2 %v2959_v26 }
 0x64a   : > { %2153 = vmatpush.bf16.msra.mxu2 %v2958_v4 }
 0x64e   : > { %2154 = vmatpush.bf16.msra.mxu2 %v2957_v14 }
 0x652   : > { %2155 = vmatpush.bf16.msra.mxu2 %v2956_v40 }
 0x6a3   : > { %v1963_v23 = vpop.permute.xlu1 %1962 }
 0x6b8   : > { %v1977_v24 = vpop.f32.mrf.mxu2 }
 0x6b9   : > { %v1978_v36 = vadd.f32 %v1977_v24, %v1963_v23 }
 0x6bb   : > { %v1981_v50 = vmax.f32 %v1978_v36, 0.0 }
 0x6bd   : > { %v1983_v51 = vpack.c.bf16 %v1981_v50, %v1981_v50 }
 0x6bf   : > { %v1989_v53 = vsel %vm1075_vm1, %v1983_v51, 0 }
 0x6c0   : > { %1998 = vmatpush.bf16.msrb.mxu3 %v1989_v53  ;;  %v1979_v2 = vpop.f32.mrf.mxu2 }
 0x6c3   : > { %2751 = vmatmul.msk.bf16.vlgmr.msrb.gmra.mxu3 %vm1984_vm6, %v1982_v62 }
 0x6c4   : > { %2073 = vmatpush.bf16.msra.mxu3 %v2783_v19 }
 0x6c8   : > { %2074 = vmatpush.bf16.msra.mxu3 %v2775_v48 }
 0x6cc   : > { %2075 = vmatpush.bf16.msra.mxu3 %v2767_v32 }
 0x6d0   : > { %2076 = vmatpush.bf16.msra.mxu3 %v2759_v22 }
 0x6d4   : > { %2229 = vmatpush.bf16.msrb.mxu3 %v2971_v30 }
 0x6d8   : > { %2230 = vmatpush.bf16.msrb.mxu3 %v2970_v1 }
 0x6dc   : > { %2231 = vmatpush.bf16.msrb.mxu3 %v2969_v21 }
 0x6e0   : > { %2232 = vmatpush.bf16.msrb.mxu3 %v2968_v55 }
 0x6e4   : > { %2233 = vmatpush.bf16.msrb.mxu3 %v2967_v44 }
 0x6e8   : > { %2234 = vmatpush.bf16.msrb.mxu3 %v2966_v0 }
 0x6ec   : > { %2235 = vmatpush.bf16.msrb.mxu3 %v2965_v34 }
 0x6f0   : > { %2236 = vmatpush.bf16.msrb.mxu3 %v2964_v46 }
 0x746   : > { %v2000_v45 = vpop.f32.mrf.mxu3 }
 0x747   : > { %v2004_v33 = vpack.c.bf16 %v2000_v45, %v2000_v45 }
 0x749   : > { %2784 = vmatmul.msk.bf16.vlgmr.msrb.gmra.mxu2 %vm1631_vm3, %v2004_v33  ;;  %2785 = vmatmul.msk.bf16.vlgmr.msra.gmra.mxu3 %vm1631_vm3, %v2004_v33 }
 0x74e   : > { %v2002_v31 = vpop.f32.mrf.mxu3 }
 0x7cc   : > { %v2065_v10 = vpop.f32.mrf.mxu2  ;;  %v2078_v35 = vpop.f32.mrf.mxu3 }
 0x7cd   : > { %v2082_v38 = vmax.f32 %v2065_v10, 0.0 }
 0x7cf   : > { %v2083_v56 = vpack.c.bf16 %v2082_v38, %v2082_v38 }
 0x7d1   : > { %2156 = vmatmul.bf16.vlgmr.msra.gmra.mxu2 %v2083_v56 }
 0x7d4   : > { %v2067_v18 = vpop.f32.mrf.mxu2  ;;  %v2080_v63 = vpop.f32.mrf.mxu3 }
 0x854   : > { %v2157_v59 = vpop.f32.mrf.mxu2 }
 0x855   : > { %v2158_v37 = vadd.f32 %v2157_v59, %v2078_v35 }
 0x857   : > { %v2161_v57 = vmax.f32 %v2158_v37, 0.0 }
 0x859   : > { %v2163_v41 = vpack.c.bf16 %v2161_v57, %v2161_v57 }
 0x85b   : > { %2237 = vmatmul.bf16.vlgmr.msrb.gmra.mxu3 %v2163_v41 }
 0x85c   : > { %v2159_v58 = vpop.f32.mrf.mxu2 }
 0x8de   : > { %v2238_v7 = vpop.f32.mrf.mxu3 }
 0x8df   : > { %v2239_v13 = vadd.f32 %v2238_v7, %v2180_v28 }
 0x8e1   : > { %2243 = vst.msk [vmem:[%s486_s27] sm:$0x1] %vm2242_vm7, %v2239_v13 }
 0x8e2   : > { %3053 = shalt.err (!%p3050_p3)
}
 0x8e3   : > { %2983 = dma.vmem_to_hbm [thread:$0]  (%p3212_p5), %s2256_s16, 16, %s2258_s0, %s2245_s23  }
 0x8e6   : > { %v2240_v52 = vpop.f32.mrf.mxu3 }
 0x8e7 PF: > { %p2989_p4 = scmp.ge.s32.totalorder %s3088_s21, 2  ;;  %s2269_s24 = sand.u32 1, %s3076_s18  }
 0x8e8   : > { %s2270_s20 = scalar_lea.sflag [#allocation3], %s2269_s24 }
 0x8e9   : > { %p2986_p7 = pnand %p2989_p4, %p3216_p6 }
 0x8eb   : > { %p2987_p8 = pneg %p2986_p7 }
 0x8ed   : > { %3071 = dma.done.wait (%p2987_p8), %s2270_s20, 16  }
 0x8ee   : > { %3073 = vsyncadd (%p2987_p8), %s2270_s20, 4294967280  ;;  %s3891_s21 = sld [smem:[#allocation6_spill]]  ;;  %s3894_s18 = smov %s3080_s19 }
 0x8ef   : > { %s3892_s1 = sld [smem:[#allocation5_spill]] }
 0x8f0   : > { %s3893_s20 = sld [smem:[#allocation7_spill]] }
 0x8f4   : > { %p25_p9 = scmp.ge.s32.totalorder %s3891_s21, 4  }
 0x8f5   : > { %s3895_s19 = smov %s3892_s1 }
 0x8f6   :  { %27 = sbr.rel (!%p25_p9) target bundleno = 7 (0x7), region = 115 }
 0x8fb   :  { %2275 = vsyncpa [#allocation3], 1 }
 0x8fc   :  { %2277 = vsyncpa [#allocation3 + $0x1], 1 }

</bundles_post_ra>
